<compile_context>
chip_gen: v5e
topology: v5e:2x2
jax: 0.10.0
libtpu: 0.0.40
codegen_flags: <defaults>
</compile_context>

<pallas_src>
import functools

import jax
import jax.numpy as jnp
from jax.experimental import pallas as pl
from jax.experimental.pallas import tpu as pltpu


# --------------------------------------------------------------------------- #
# Pass 1: per-node projections (everything linear in a single node).
# Feature-major: nodes on the 128-lane axis, all stores lane-dense.
# --------------------------------------------------------------------------- #
def node_proj_kernel(*refs, n_pe):
    (x_ref, en_ref, wxp_ref, bp_ref, bt_ref, te0w_ref, te0b_ref,
     w2a_ref, w2b_ref, c2_ref) = refs[:10]
    pe_refs = refs[10:10 + 2 * n_pe]
    d_ref, s_ref = refs[10 + 2 * n_pe:]

    x = x_ref[...]                       # (Fx,  T)
    en = en_ref[...]                     # (Fen, T)
    fxo = bt_ref.shape[0]

    # theta & phi projections with ONE stacked matmul.
    xp = jnp.dot(wxp_ref[...], x, preferred_element_type=jnp.float32)   # (2*Fxo, T)
    tx = xp[:fxo]                        # W_theta^T x           (no bias)
    px = xp[fxo:] + bp_ref[...]          # W_phi^T x + b_phi

    # First (linear) layer of theta_en, hoisted out of the per-edge MLP.
    te0 = jnp.dot(te0w_ref[...], en, preferred_element_type=jnp.float32)  # (F0, T)

    # phi_en MLP (source-only, fully hoisted).
    h = en
    for li in range(n_pe):
        w = pe_refs[2 * li][...]
        b = pe_refs[2 * li + 1][...]
        h = jnp.dot(w, h, preferred_element_type=jnp.float32) + b
        if li < n_pe - 1:
            h = jnp.maximum(h, 0.0)
    pe = h                               # (Feno, T)

    # W2 partial dot products as sublane reductions (no 8x1 MXU matmul).
    a = jnp.sum(w2a_ref[...] * tx, axis=0, keepdims=True)      # w2a . (W_theta x)
    bsum = jnp.sum(w2b_ref[...] * px, axis=0, keepdims=True)   # w2b . phi_x
    u = a + c2_ref[...]                  # dst part of logit (c2 = w2a.b_theta + b2 folded)
    v = bsum - a                         # src part of logit

    # dst table: biases folded in so pass 2 needs no extra constants.
    d_ref[...] = jnp.concatenate([tx + bt_ref[...], te0 + te0b_ref[...], u], axis=0)
    # src table: fields gathered by neighbor index between the two passes.
    s_ref[...] = jnp.concatenate([px - tx, te0, pe, v], axis=0)


# --------------------------------------------------------------------------- #
# Pass 2: per-edge work + aggregation on (field-outer, k-inner) slabs.
# --------------------------------------------------------------------------- #
def edge_agg_kernel(*refs, k, n_bd):
    d_ref, s_ref, rep0_ref, mmean_ref = refs[:4]
    bd_refs = refs[4:4 + 2 * n_bd]
    x_out_ref, en_out_ref, sc_out_ref = refs[4 + 2 * n_bd:]

    fxo = x_out_ref.shape[0]
    f0 = rep0_ref.shape[1]
    feno = en_out_ref.shape[0]

    dst = d_ref[...]                      # (Fdst, T)
    base_x = dst[:fxo]                    # theta(x_i) + b_theta
    base_h0 = dst[fxo:fxo + f0]           # W0 en_i + b0
    base_logit = dst[fxo + f0:fxo + f0 + 1]   # w2a.theta(x_i) + w2a.b_theta + b2

    off_te0 = fxo * k
    off_pe = off_te0 + f0 * k
    off_v = off_pe + feno * k

    # x: max_k(theta_x + phi_x) = base_x + groupmax_k(phi_x_j - theta_proj_j).
    # Groups are k contiguous slab rows -> plain sublane reduces.
    cols = []
    for f in range(fxo):
        grp = s_ref[f * k:(f + 1) * k, :]                   # (k, T)
        cols.append(jnp.max(grp, axis=0, keepdims=True))
    x_out_ref[...] = base_x + jnp.concatenate(cols, axis=0)

    # score: sigmoid is monotone -> sigmoid(max_k(logit)) == max_k(sigmoid(logit)).
    v_slab = s_ref[off_v:off_v + k, :]                      # (k, T)
    sc_out_ref[...] = jax.nn.sigmoid(
        base_logit + jnp.max(v_slab, axis=0, keepdims=True))

    # en: theta_en MLP (layer 0 hoisted to pass 1) as block-diagonal matmuls.
    te0_slab = s_ref[off_te0:off_te0 + f0 * k, :]           # (F0*k, T)
    # broadcast of the dst term across k done as a kron(I, 1_k) matmul (no reshape)
    h = jnp.dot(rep0_ref[...], base_h0,
                preferred_element_type=jnp.float32) - te0_slab
    for li in range(n_bd):
        h = jnp.maximum(h, 0.0)           # ReLU after every layer but the last
        w = bd_refs[2 * li][...]          # kron(W_l^T, I_k)
        b = bd_refs[2 * li + 1][...]      # repeat(b_l, k)
        h = jnp.dot(w, h, preferred_element_type=jnp.float32) + b
    pe_slab = s_ref[off_pe:off_pe + feno * k, :]            # (Feno*k, T)
    # mean over k as a tiny matmul: kron(I_Feno, 1_k/k)
    en_out_ref[...] = jnp.dot(mmean_ref[...], h + pe_slab,
                              preferred_element_type=jnp.float32)


# --------------------------------------------------------------------------- #
# Host wrapper.
# --------------------------------------------------------------------------- #
def edgeconv_forward(x, en, nbrs, params, *, tile_n=1024):
    N, Fx = x.shape
    Fen = en.shape[1]
    k = nbrs.shape[1]

    th_w, th_b = params["theta"]           # (Fx, Fxo), (1, Fxo)
    ph_w, ph_b = params["phi"]
    w2_w, w2_b = params["W2"]              # (2*Fxo, 1), (1, 1)
    fxo = th_w.shape[1]

    te_layers = params["theta_en"]         # list of (w, b)
    pe_layers = params["phi_en"]
    f0 = te_layers[0][0].shape[1]          # first hidden width of theta_en
    feno = te_layers[-1][0].shape[1]       # out width of theta_en / phi_en

    # Pad the node axis to a multiple of tile_n (lane dim must be a 128-multiple);
    # padded rows gather node 0 and their outputs are discarded.
    n_pad = pl.cdiv(N, tile_n) * tile_n
    pad = n_pad - N
    x_fm = jnp.pad(x, ((0, pad), (0, 0))).T          # (Fx,  n_pad)
    en_fm = jnp.pad(en, ((0, pad), (0, 0))).T        # (Fen, n_pad)
    nbrs_pad = jnp.pad(nbrs, ((0, pad), (0, 0)))     # (n_pad, k), all in-bounds

    # ---- pass-1 constants (feature-major, biases pre-transposed) -------------
    wxp = jnp.concatenate([th_w.T, ph_w.T], axis=0)  # (2*Fxo, Fx)
    bp = ph_b.T                                      # (Fxo, 1)
    bt = th_b.T
    te0_w = te_layers[0][0].T                        # (F0, Fen)
    te0_b = te_layers[0][1].T                        # (F0, 1)
    w2a = w2_w[:fxo, :]                              # (Fxo, 1)
    w2b = w2_w[fxo:, :]
    c2 = (jnp.sum(w2a * bt) + w2_b[0, 0]).reshape(1, 1)   # w2a.b_theta + b2

    pe_flat = []
    for (w, b) in pe_layers:
        pe_flat += [w.T, b.T]

    node_consts = [wxp, bp, bt, te0_w, te0_b, w2a, w2b, c2] + pe_flat
    f_dst = fxo + f0 + 1
    f_src = fxo + f0 + feno + 1

    grid = (n_pad // tile_n,)
    full_spec = lambda p: pl.BlockSpec(p.shape, lambda i, nd=p.ndim: (0,) * nd)

    # ---- pass 1: per-node projections ----------------------------------------
    a_in_specs = ([pl.BlockSpec((Fx, tile_n), lambda i: (0, i)),
                   pl.BlockSpec((Fen, tile_n), lambda i: (0, i))]
                  + [full_spec(p) for p in node_consts])
    a_out_specs = [pl.BlockSpec((f_dst, tile_n), lambda i: (0, i)),
                   pl.BlockSpec((f_src, tile_n), lambda i: (0, i))]
    a_out_shape = [jax.ShapeDtypeStruct((f_dst, n_pad), jnp.float32),
                   jax.ShapeDtypeStruct((f_src, n_pad), jnp.float32)]
    d_tab, s_tab = pl.pallas_call(
        functools.partial(node_proj_kernel, n_pe=len(pe_layers)),
        out_shape=a_out_shape,
        grid=grid,
        in_specs=a_in_specs,
        out_specs=a_out_specs,
        compiler_params=pltpu.CompilerParams(dimension_semantics=("parallel",)),
    )(x_fm, en_fm, *node_consts)

    # ---- ONE neighbor gather (XLA glue) ---------------------------------------
    # Row-gather a node-major table (minor dim = F_src, contiguous rows), then one
    # transpose + free reshape into the (field-outer, k-inner) slab for pass 2.
    s_nm = s_tab.T                                            # (n_pad, F_src)
    g = s_nm.at[nbrs_pad].get(mode="promise_in_bounds")       # (n_pad, k, F_src)
    src_slab = jnp.transpose(g, (2, 1, 0)).reshape(f_src * k, n_pad)

    # ---- pass-2 constants: block-diagonal theta_en + aggregation matrices -----
    eye_k = jnp.eye(k, dtype=jnp.float32)
    rep0 = jnp.kron(jnp.eye(f0, dtype=jnp.float32),
                    jnp.ones((k, 1), jnp.float32))            # (F0*k, F0)
    mmean = jnp.kron(jnp.eye(feno, dtype=jnp.float32),
                     jnp.full((1, k), 1.0 / k, jnp.float32))  # (Feno, Feno*k)
    bd_flat = []
    for (w, b) in te_layers[1:]:
        bd_flat += [jnp.kron(w.T, eye_k), jnp.repeat(b.T, k, axis=0)]
    edge_consts = [rep0, mmean] + bd_flat

    # ---- pass 2: per-edge work + aggregation ----------------------------------
    b_in_specs = ([pl.BlockSpec((f_dst, tile_n), lambda i: (0, i)),
                   pl.BlockSpec((f_src * k, tile_n), lambda i: (0, i))]
                  + [full_spec(p) for p in edge_consts])
    b_out_specs = [pl.BlockSpec((fxo, tile_n), lambda i: (0, i)),
                   pl.BlockSpec((feno, tile_n), lambda i: (0, i)),
                   pl.BlockSpec((1, tile_n), lambda i: (0, i))]
    b_out_shape = [jax.ShapeDtypeStruct((fxo, n_pad), jnp.float32),
                   jax.ShapeDtypeStruct((feno, n_pad), jnp.float32),
                   jax.ShapeDtypeStruct((1, n_pad), jnp.float32)]
    x_fm_out, en_fm_out, sc_fm_out = pl.pallas_call(
        functools.partial(edge_agg_kernel, k=k, n_bd=len(te_layers) - 1),
        out_shape=b_out_shape,
        grid=grid,
        in_specs=b_in_specs,
        out_specs=b_out_specs,
        compiler_params=pltpu.CompilerParams(dimension_semantics=("parallel",)),
    )(d_tab, src_slab, *edge_consts)

    # Slice padding off, then back to node-major (XLA glue, outside the kernels).
    return (x_fm_out[:, :N].T, en_fm_out[:, :N].T, sc_fm_out[:, :N].T)


# --------------------------------------------------------------------------- #
# Parameter init mirroring the PyTorch module (Linear + build_mlp([4,5,4])).
# --------------------------------------------------------------------------- #
def init_linear(key, fan_in, fan_out):
    kw, kb = jax.random.split(key)
    bound = 1.0 / (fan_in ** 0.5)
    w = jax.random.uniform(kw, (fan_in, fan_out), jnp.float32, -bound, bound)
    b = jax.random.uniform(kb, (1, fan_out), jnp.float32, -bound, bound)
    return w, b


def init_mlp(key, in_f, out_f, features=(4, 5, 4)):
    sizes = (in_f,) + tuple(features) + (out_f,)
    keys = jax.random.split(key, len(sizes) - 1)
    return [init_linear(kk, a, b) for kk, a, b in zip(keys, sizes[:-1], sizes[1:])]


if __name__ == "__main__":
    in_feat_x, out_feat_x = 4, 8
    in_feat_en, out_feat_en = 2, 2
    k_val = 5
    N = 600   # not a multiple of the tile -> exercises the cdiv/pad path

    root = jax.random.PRNGKey(0)
    kx, ken, kp1, kp2, kp3, kp4, kp5 = jax.random.split(root, 7)

    x = jax.random.normal(kx, (N, in_feat_x), jnp.float32)
    en = jax.random.normal(ken, (N, in_feat_en), jnp.float32)
    # deterministic "graph": node i receives edges from nodes (i+1 .. i+k) mod N
    nbrs = (jnp.arange(N)[:, None] + jnp.arange(1, k_val + 1)[None, :]) % N
    nbrs = nbrs.astype(jnp.int32)

    params = {
        "theta": init_linear(kp1, in_feat_x, out_feat_x),
        "phi": init_linear(kp2, in_feat_x, out_feat_x),
        "W2": init_linear(kp3, 2 * out_feat_x, 1),
        "theta_en": init_mlp(kp4, in_feat_en, out_feat_en),
        "phi_en": init_mlp(kp5, in_feat_en, out_feat_en),
    }

    # tile_n=512 keeps demo padding modest and gives an even 2-step parallel grid.
    fwd = jax.jit(functools.partial(edgeconv_forward, tile_n=512))
    x_out, en_out, score_out = fwd(x, en, nbrs, params)
    jax.block_until_ready((x_out, en_out, score_out))

    # plain-JAX reference for a correctness sanity check
    def ref(x, en, nbrs, params):
        x_src = x[nbrs]; en_src = en[nbrs]
        x_dst = x[:, None, :]; en_dst = en[:, None, :]
        tw, tb = params["theta"]; pw, pb = params["phi"]; w2w, w2b = params["W2"]
        theta_x = (x_dst - x_src) @ tw + tb
        phi_x = x_src @ pw + pb

        def run_mlp(h, layers):
            for i, (w, b) in enumerate(layers):
                h = h @ w + b
                if i < len(layers) - 1:
                    h = jnp.maximum(h, 0.0)
            return h

        theta_en = run_mlp(en_dst - en_src, params["theta_en"])
        phi_en = run_mlp(en_src, params["phi_en"])
        logit = jnp.concatenate([theta_x, phi_x], axis=-1) @ w2w + w2b
        score = jax.nn.sigmoid(logit)
        return ((theta_x + phi_x).max(1),
                (theta_en + phi_en).mean(1),
                score.max(1))

    rx, ren, rs = ref(x, en, nbrs, params)
    assert jnp.allclose(x_out, rx, atol=1e-4), "x mismatch"
    assert jnp.allclose(en_out, ren, atol=1e-4), "en mismatch"
    assert jnp.allclose(score_out, rs, atol=1e-4), "score mismatch"
    print("KERNEL_OK")
</pallas_src>

<mosaic_0001>
module attributes {stable_mosaic.version = 11 : i64} {
  func.func @node_proj_kernel(%arg0: i32, %arg1: memref<4x512xf32, #tpu.memory_space<vmem>>, %arg2: memref<2x512xf32, #tpu.memory_space<vmem>>, %arg3: memref<16x4xf32, #tpu.memory_space<vmem>>, %arg4: memref<8x1xf32, #tpu.memory_space<vmem>>, %arg5: memref<8x1xf32, #tpu.memory_space<vmem>>, %arg6: memref<4x2xf32, #tpu.memory_space<vmem>>, %arg7: memref<4x1xf32, #tpu.memory_space<vmem>>, %arg8: memref<8x1xf32, #tpu.memory_space<vmem>>, %arg9: memref<8x1xf32, #tpu.memory_space<vmem>>, %arg10: memref<1x1xf32, #tpu.memory_space<vmem>>, %arg11: memref<4x2xf32, #tpu.memory_space<vmem>>, %arg12: memref<4x1xf32, #tpu.memory_space<vmem>>, %arg13: memref<5x4xf32, #tpu.memory_space<vmem>>, %arg14: memref<5x1xf32, #tpu.memory_space<vmem>>, %arg15: memref<4x5xf32, #tpu.memory_space<vmem>>, %arg16: memref<4x1xf32, #tpu.memory_space<vmem>>, %arg17: memref<2x4xf32, #tpu.memory_space<vmem>>, %arg18: memref<2x1xf32, #tpu.memory_space<vmem>>, %arg19: memref<13x512xf32, #tpu.memory_space<vmem>>, %arg20: memref<15x512xf32, #tpu.memory_space<vmem>>) attributes {dimension_semantics = [#tpu.dimension_semantics<parallel>], iteration_bounds = array<i64: 2>, scalar_prefetch = 0 : i64, scratch_operands = 0 : i64, tpu.core_type = #tpu.core_type<tc>, window_params = [{transform_indices = @transform_0, window_bounds = array<i64: 4, 512>}, {transform_indices = @transform_1, window_bounds = array<i64: 2, 512>}, {pipeline_mode = #tpu.pipeline_mode<synchronous>, transform_indices = @transform_2, window_bounds = array<i64: 16, 4>}, {pipeline_mode = #tpu.pipeline_mode<synchronous>, transform_indices = @transform_3, window_bounds = array<i64: 8, 1>}, {pipeline_mode = #tpu.pipeline_mode<synchronous>, transform_indices = @transform_4, window_bounds = array<i64: 8, 1>}, {pipeline_mode = #tpu.pipeline_mode<synchronous>, transform_indices = @transform_5, window_bounds = array<i64: 4, 2>}, {pipeline_mode = #tpu.pipeline_mode<synchronous>, transform_indices = @transform_6, window_bounds = array<i64: 4, 1>}, {pipeline_mode = #tpu.pipeline_mode<synchronous>, transform_indices = @transform_7, window_bounds = array<i64: 8, 1>}, {pipeline_mode = #tpu.pipeline_mode<synchronous>, transform_indices = @transform_8, window_bounds = array<i64: 8, 1>}, {pipeline_mode = #tpu.pipeline_mode<synchronous>, transform_indices = @transform_9, window_bounds = array<i64: 1, 1>}, {pipeline_mode = #tpu.pipeline_mode<synchronous>, transform_indices = @transform_10, window_bounds = array<i64: 4, 2>}, {pipeline_mode = #tpu.pipeline_mode<synchronous>, transform_indices = @transform_11, window_bounds = array<i64: 4, 1>}, {pipeline_mode = #tpu.pipeline_mode<synchronous>, transform_indices = @transform_12, window_bounds = array<i64: 5, 4>}, {pipeline_mode = #tpu.pipeline_mode<synchronous>, transform_indices = @transform_13, window_bounds = array<i64: 5, 1>}, {pipeline_mode = #tpu.pipeline_mode<synchronous>, transform_indices = @transform_14, window_bounds = array<i64: 4, 5>}, {pipeline_mode = #tpu.pipeline_mode<synchronous>, transform_indices = @transform_15, window_bounds = array<i64: 4, 1>}, {pipeline_mode = #tpu.pipeline_mode<synchronous>, transform_indices = @transform_16, window_bounds = array<i64: 2, 4>}, {pipeline_mode = #tpu.pipeline_mode<synchronous>, transform_indices = @transform_17, window_bounds = array<i64: 2, 1>}, {transform_indices = @transform_18, window_bounds = array<i64: 13, 512>}, {transform_indices = @transform_19, window_bounds = array<i64: 15, 512>}]} {
    %c0 = arith.constant 0 : index
    %c0_0 = arith.constant 0 : index
    %0 = vector.load %arg1[%c0, %c0_0] : memref<4x512xf32, #tpu.memory_space<vmem>>, vector<4x512xf32>
    %c0_1 = arith.constant 0 : index
    %c0_2 = arith.constant 0 : index
    %1 = vector.load %arg2[%c0_1, %c0_2] : memref<2x512xf32, #tpu.memory_space<vmem>>, vector<2x512xf32>
    %c0_3 = arith.constant 0 : index
    %c0_4 = arith.constant 0 : index
    %2 = vector.load %arg3[%c0_3, %c0_4] : memref<16x4xf32, #tpu.memory_space<vmem>>, vector<16x4xf32>
    %cst = arith.constant dense<0.000000e+00> : vector<16x512xf32>
    %3 = tpu.matmul %2, %0, %cst {dimension_numbers = #tpu.dot_dimension_numbers<[1], [0], [0], [1], [0, 0, 1, 1], [], []>} : vector<16x4xf32>, vector<4x512xf32>, vector<16x512xf32> -> vector<16x512xf32>
    %4 = vector.extract_strided_slice %3 {offsets = [0, 0], sizes = [8, 512], strides = [1, 1]} : vector<16x512xf32> to vector<8x512xf32>
    %5 = vector.extract_strided_slice %3 {offsets = [8, 0], sizes = [8, 512], strides = [1, 1]} : vector<16x512xf32> to vector<8x512xf32>
    %c0_5 = arith.constant 0 : index
    %c0_6 = arith.constant 0 : index
    %6 = vector.load %arg4[%c0_5, %c0_6] : memref<8x1xf32, #tpu.memory_space<vmem>>, vector<8x1xf32>
    %7 = vector.broadcast %6 : vector<8x1xf32> to vector<8x512xf32>
    %8 = arith.addf %5, %7 : vector<8x512xf32>
    %c0_7 = arith.constant 0 : index
    %c0_8 = arith.constant 0 : index
    %9 = vector.load %arg6[%c0_7, %c0_8] : memref<4x2xf32, #tpu.memory_space<vmem>>, vector<4x2xf32>
    %cst_9 = arith.constant dense<0.000000e+00> : vector<4x512xf32>
    %10 = tpu.matmul %9, %1, %cst_9 {dimension_numbers = #tpu.dot_dimension_numbers<[1], [0], [0], [1], [0, 0, 1, 1], [], []>} : vector<4x2xf32>, vector<2x512xf32>, vector<4x512xf32> -> vector<4x512xf32>
    %c0_10 = arith.constant 0 : index
    %c0_11 = arith.constant 0 : index
    %11 = vector.load %arg11[%c0_10, %c0_11] : memref<4x2xf32, #tpu.memory_space<vmem>>, vector<4x2xf32>
    %c0_12 = arith.constant 0 : index
    %c0_13 = arith.constant 0 : index
    %12 = vector.load %arg12[%c0_12, %c0_13] : memref<4x1xf32, #tpu.memory_space<vmem>>, vector<4x1xf32>
    %cst_14 = arith.constant dense<0.000000e+00> : vector<4x512xf32>
    %13 = tpu.matmul %11, %1, %cst_14 {dimension_numbers = #tpu.dot_dimension_numbers<[1], [0], [0], [1], [0, 0, 1, 1], [], []>} : vector<4x2xf32>, vector<2x512xf32>, vector<4x512xf32> -> vector<4x512xf32>
    %14 = vector.broadcast %12 : vector<4x1xf32> to vector<4x512xf32>
    %15 = arith.addf %13, %14 : vector<4x512xf32>
    %cst_15 = arith.constant 0.000000e+00 : f32
    %16 = vector.broadcast %cst_15 : f32 to vector<4x512xf32>
    %17 = arith.maximumf %15, %16 : vector<4x512xf32>
    %c0_16 = arith.constant 0 : index
    %c0_17 = arith.constant 0 : index
    %18 = vector.load %arg13[%c0_16, %c0_17] : memref<5x4xf32, #tpu.memory_space<vmem>>, vector<5x4xf32>
    %c0_18 = arith.constant 0 : index
    %c0_19 = arith.constant 0 : index
    %19 = vector.load %arg14[%c0_18, %c0_19] : memref<5x1xf32, #tpu.memory_space<vmem>>, vector<5x1xf32>
    %cst_20 = arith.constant dense<0.000000e+00> : vector<5x512xf32>
    %20 = tpu.matmul %18, %17, %cst_20 {dimension_numbers = #tpu.dot_dimension_numbers<[1], [0], [0], [1], [0, 0, 1, 1], [], []>} : vector<5x4xf32>, vector<4x512xf32>, vector<5x512xf32> -> vector<5x512xf32>
    %21 = vector.broadcast %19 : vector<5x1xf32> to vector<5x512xf32>
    %22 = arith.addf %20, %21 : vector<5x512xf32>
    %cst_21 = arith.constant 0.000000e+00 : f32
    %23 = vector.broadcast %cst_21 : f32 to vector<5x512xf32>
    %24 = arith.maximumf %22, %23 : vector<5x512xf32>
    %c0_22 = arith.constant 0 : index
    %c0_23 = arith.constant 0 : index
    %25 = vector.load %arg15[%c0_22, %c0_23] : memref<4x5xf32, #tpu.memory_space<vmem>>, vector<4x5xf32>
    %c0_24 = arith.constant 0 : index
    %c0_25 = arith.constant 0 : index
    %26 = vector.load %arg16[%c0_24, %c0_25] : memref<4x1xf32, #tpu.memory_space<vmem>>, vector<4x1xf32>
    %cst_26 = arith.constant dense<0.000000e+00> : vector<4x512xf32>
    %27 = tpu.matmul %25, %24, %cst_26 {dimension_numbers = #tpu.dot_dimension_numbers<[1], [0], [0], [1], [0, 0, 1, 1], [], []>} : vector<4x5xf32>, vector<5x512xf32>, vector<4x512xf32> -> vector<4x512xf32>
    %28 = vector.broadcast %26 : vector<4x1xf32> to vector<4x512xf32>
    %29 = arith.addf %27, %28 : vector<4x512xf32>
    %cst_27 = arith.constant 0.000000e+00 : f32
    %30 = vector.broadcast %cst_27 : f32 to vector<4x512xf32>
    %31 = arith.maximumf %29, %30 : vector<4x512xf32>
    %c0_28 = arith.constant 0 : index
    %c0_29 = arith.constant 0 : index
    %32 = vector.load %arg17[%c0_28, %c0_29] : memref<2x4xf32, #tpu.memory_space<vmem>>, vector<2x4xf32>
    %c0_30 = arith.constant 0 : index
    %c0_31 = arith.constant 0 : index
    %33 = vector.load %arg18[%c0_30, %c0_31] : memref<2x1xf32, #tpu.memory_space<vmem>>, vector<2x1xf32>
    %cst_32 = arith.constant dense<0.000000e+00> : vector<2x512xf32>
    %34 = tpu.matmul %32, %31, %cst_32 {dimension_numbers = #tpu.dot_dimension_numbers<[1], [0], [0], [1], [0, 0, 1, 1], [], []>} : vector<2x4xf32>, vector<4x512xf32>, vector<2x512xf32> -> vector<2x512xf32>
    %35 = vector.broadcast %33 : vector<2x1xf32> to vector<2x512xf32>
    %36 = arith.addf %34, %35 : vector<2x512xf32>
    %c0_33 = arith.constant 0 : index
    %c0_34 = arith.constant 0 : index
    %37 = vector.load %arg8[%c0_33, %c0_34] : memref<8x1xf32, #tpu.memory_space<vmem>>, vector<8x1xf32>
    %38 = vector.broadcast %37 : vector<8x1xf32> to vector<8x512xf32>
    %39 = arith.mulf %38, %4 : vector<8x512xf32>
    %cst_35 = arith.constant dense<0.000000e+00> : vector<512xf32>
    %40 = vector.multi_reduction <add>, %39, %cst_35 [0] : vector<8x512xf32> to vector<512xf32>
    %41 = vector.shape_cast %40 : vector<512xf32> to vector<1x512xf32>
    %c0_36 = arith.constant 0 : index
    %c0_37 = arith.constant 0 : index
    %42 = vector.load %arg9[%c0_36, %c0_37] : memref<8x1xf32, #tpu.memory_space<vmem>>, vector<8x1xf32>
    %43 = vector.broadcast %42 : vector<8x1xf32> to vector<8x512xf32>
    %44 = arith.mulf %43, %8 : vector<8x512xf32>
    %cst_38 = arith.constant dense<0.000000e+00> : vector<512xf32>
    %45 = vector.multi_reduction <add>, %44, %cst_38 [0] : vector<8x512xf32> to vector<512xf32>
    %46 = vector.shape_cast %45 : vector<512xf32> to vector<1x512xf32>
    %c0_39 = arith.constant 0 : index
    %c0_40 = arith.constant 0 : index
    %47 = vector.load %arg10[%c0_39, %c0_40] : memref<1x1xf32, #tpu.memory_space<vmem>>, vector<1x1xf32>
    %48 = vector.broadcast %47 : vector<1x1xf32> to vector<1x512xf32>
    %49 = arith.addf %41, %48 : vector<1x512xf32>
    %50 = arith.subf %46, %41 : vector<1x512xf32>
    %c0_41 = arith.constant 0 : index
    %c0_42 = arith.constant 0 : index
    %51 = vector.load %arg5[%c0_41, %c0_42] : memref<8x1xf32, #tpu.memory_space<vmem>>, vector<8x1xf32>
    %52 = vector.broadcast %51 : vector<8x1xf32> to vector<8x512xf32>
    %53 = arith.addf %4, %52 : vector<8x512xf32>
    %c0_43 = arith.constant 0 : index
    %c0_44 = arith.constant 0 : index
    %54 = vector.load %arg7[%c0_43, %c0_44] : memref<4x1xf32, #tpu.memory_space<vmem>>, vector<4x1xf32>
    %55 = vector.broadcast %54 : vector<4x1xf32> to vector<4x512xf32>
    %56 = arith.addf %10, %55 : vector<4x512xf32>
    %57 = tpu.concatenate %53, %56, %49 in 0 : vector<8x512xf32>, vector<4x512xf32>, vector<1x512xf32> -> vector<13x512xf32>
    %c0_45 = arith.constant 0 : index
    %c0_46 = arith.constant 0 : index
    %58 = vector.load %arg19[%c0_45, %c0_46] : memref<13x512xf32, #tpu.memory_space<vmem>>, vector<13x512xf32>
    tpu.vector_store %arg19[%c0_45, %c0_46], %57 {strides = array<i32>} : memref<13x512xf32, #tpu.memory_space<vmem>>, vector<13x512xf32>,
    %59 = arith.subf %8, %4 : vector<8x512xf32>
    %60 = tpu.concatenate %59, %10, %36, %50 in 0 : vector<8x512xf32>, vector<4x512xf32>, vector<2x512xf32>, vector<1x512xf32> -> vector<15x512xf32>
    %c0_47 = arith.constant 0 : index
    %c0_48 = arith.constant 0 : index
    %61 = vector.load %arg20[%c0_47, %c0_48] : memref<15x512xf32, #tpu.memory_space<vmem>>, vector<15x512xf32>
    tpu.vector_store %arg20[%c0_47, %c0_48], %60 {strides = array<i32>} : memref<15x512xf32, #tpu.memory_space<vmem>>, vector<15x512xf32>,
    return
  }
  func.func @transform_0(%arg0: i32) -> (i32, i32) {
    %c0_i32 = arith.constant 0 : i32
    %c0_i32_0 = arith.constant 0 : i32
    return %c0_i32, %arg0 : i32, i32
  }
  func.func @transform_1(%arg0: i32) -> (i32, i32) {
    %c0_i32 = arith.constant 0 : i32
    %c0_i32_0 = arith.constant 0 : i32
    return %c0_i32, %arg0 : i32, i32
  }
  func.func @transform_2(%arg0: i32) -> (i32, i32) {
    %c0_i32 = arith.constant 0 : i32
    %c0_i32_0 = arith.constant 0 : i32
    %c0_i32_1 = arith.constant 0 : i32
    return %c0_i32, %c0_i32_0 : i32, i32
  }
  func.func @transform_3(%arg0: i32) -> (i32, i32) {
    %c0_i32 = arith.constant 0 : i32
    %c0_i32_0 = arith.constant 0 : i32
    %c0_i32_1 = arith.constant 0 : i32
    return %c0_i32, %c0_i32_0 : i32, i32
  }
  func.func @transform_4(%arg0: i32) -> (i32, i32) {
    %c0_i32 = arith.constant 0 : i32
    %c0_i32_0 = arith.constant 0 : i32
    %c0_i32_1 = arith.constant 0 : i32
    return %c0_i32, %c0_i32_0 : i32, i32
  }
  func.func @transform_5(%arg0: i32) -> (i32, i32) {
    %c0_i32 = arith.constant 0 : i32
    %c0_i32_0 = arith.constant 0 : i32
    %c0_i32_1 = arith.constant 0 : i32
    return %c0_i32, %c0_i32_0 : i32, i32
  }
  func.func @transform_6(%arg0: i32) -> (i32, i32) {
    %c0_i32 = arith.constant 0 : i32
    %c0_i32_0 = arith.constant 0 : i32
    %c0_i32_1 = arith.constant 0 : i32
    return %c0_i32, %c0_i32_0 : i32, i32
  }
  func.func @transform_7(%arg0: i32) -> (i32, i32) {
    %c0_i32 = arith.constant 0 : i32
    %c0_i32_0 = arith.constant 0 : i32
    %c0_i32_1 = arith.constant 0 : i32
    return %c0_i32, %c0_i32_0 : i32, i32
  }
  func.func @transform_8(%arg0: i32) -> (i32, i32) {
    %c0_i32 = arith.constant 0 : i32
    %c0_i32_0 = arith.constant 0 : i32
    %c0_i32_1 = arith.constant 0 : i32
    return %c0_i32, %c0_i32_0 : i32, i32
  }
  func.func @transform_9(%arg0: i32) -> (i32, i32) {
    %c0_i32 = arith.constant 0 : i32
    %c0_i32_0 = arith.constant 0 : i32
    %c0_i32_1 = arith.constant 0 : i32
    return %c0_i32, %c0_i32_0 : i32, i32
  }
  func.func @transform_10(%arg0: i32) -> (i32, i32) {
    %c0_i32 = arith.constant 0 : i32
    %c0_i32_0 = arith.constant 0 : i32
    %c0_i32_1 = arith.constant 0 : i32
    return %c0_i32, %c0_i32_0 : i32, i32
  }
  func.func @transform_11(%arg0: i32) -> (i32, i32) {
    %c0_i32 = arith.constant 0 : i32
    %c0_i32_0 = arith.constant 0 : i32
    %c0_i32_1 = arith.constant 0 : i32
    return %c0_i32, %c0_i32_0 : i32, i32
  }
  func.func @transform_12(%arg0: i32) -> (i32, i32) {
    %c0_i32 = arith.constant 0 : i32
    %c0_i32_0 = arith.constant 0 : i32
    %c0_i32_1 = arith.constant 0 : i32
    return %c0_i32, %c0_i32_0 : i32, i32
  }
  func.func @transform_13(%arg0: i32) -> (i32, i32) {
    %c0_i32 = arith.constant 0 : i32
    %c0_i32_0 = arith.constant 0 : i32
    %c0_i32_1 = arith.constant 0 : i32
    return %c0_i32, %c0_i32_0 : i32, i32
  }
  func.func @transform_14(%arg0: i32) -> (i32, i32) {
    %c0_i32 = arith.constant 0 : i32
    %c0_i32_0 = arith.constant 0 : i32
    %c0_i32_1 = arith.constant 0 : i32
    return %c0_i32, %c0_i32_0 : i32, i32
  }
  func.func @transform_15(%arg0: i32) -> (i32, i32) {
    %c0_i32 = arith.constant 0 : i32
    %c0_i32_0 = arith.constant 0 : i32
    %c0_i32_1 = arith.constant 0 : i32
    return %c0_i32, %c0_i32_0 : i32, i32
  }
  func.func @transform_16(%arg0: i32) -> (i32, i32) {
    %c0_i32 = arith.constant 0 : i32
    %c0_i32_0 = arith.constant 0 : i32
    %c0_i32_1 = arith.constant 0 : i32
    return %c0_i32, %c0_i32_0 : i32, i32
  }
  func.func @transform_17(%arg0: i32) -> (i32, i32) {
    %c0_i32 = arith.constant 0 : i32
    %c0_i32_0 = arith.constant 0 : i32
    %c0_i32_1 = arith.constant 0 : i32
    return %c0_i32, %c0_i32_0 : i32, i32
  }
  func.func @transform_18(%arg0: i32) -> (i32, i32) {
    %c0_i32 = arith.constant 0 : i32
    %c0_i32_0 = arith.constant 0 : i32
    return %c0_i32, %arg0 : i32, i32
  }
  func.func @transform_19(%arg0: i32) -> (i32, i32) {
    %c0_i32 = arith.constant 0 : i32
    %c0_i32_0 = arith.constant 0 : i32
    return %c0_i32, %arg0 : i32, i32
  }
}

module attributes {stable_mosaic.version = 11 : i64} {
  func.func @edge_agg_kernel(%arg0: i32, %arg1: memref<13x512xf32, #tpu.memory_space<vmem>>, %arg2: memref<75x512xf32, #tpu.memory_space<vmem>>, %arg3: memref<20x4xf32, #tpu.memory_space<vmem>>, %arg4: memref<2x10xf32, #tpu.memory_space<vmem>>, %arg5: memref<25x20xf32, #tpu.memory_space<vmem>>, %arg6: memref<25x1xf32, #tpu.memory_space<vmem>>, %arg7: memref<20x25xf32, #tpu.memory_space<vmem>>, %arg8: memref<20x1xf32, #tpu.memory_space<vmem>>, %arg9: memref<10x20xf32, #tpu.memory_space<vmem>>, %arg10: memref<10x1xf32, #tpu.memory_space<vmem>>, %arg11: memref<8x512xf32, #tpu.memory_space<vmem>>, %arg12: memref<2x512xf32, #tpu.memory_space<vmem>>, %arg13: memref<1x512xf32, #tpu.memory_space<vmem>>) attributes {dimension_semantics = [#tpu.dimension_semantics<parallel>], iteration_bounds = array<i64: 2>, scalar_prefetch = 0 : i64, scratch_operands = 0 : i64, tpu.core_type = #tpu.core_type<tc>, window_params = [{transform_indices = @transform_0, window_bounds = array<i64: 13, 512>}, {transform_indices = @transform_1, window_bounds = array<i64: 75, 512>}, {pipeline_mode = #tpu.pipeline_mode<synchronous>, transform_indices = @transform_2, window_bounds = array<i64: 20, 4>}, {pipeline_mode = #tpu.pipeline_mode<synchronous>, transform_indices = @transform_3, window_bounds = array<i64: 2, 10>}, {pipeline_mode = #tpu.pipeline_mode<synchronous>, transform_indices = @transform_4, window_bounds = array<i64: 25, 20>}, {pipeline_mode = #tpu.pipeline_mode<synchronous>, transform_indices = @transform_5, window_bounds = array<i64: 25, 1>}, {pipeline_mode = #tpu.pipeline_mode<synchronous>, transform_indices = @transform_6, window_bounds = array<i64: 20, 25>}, {pipeline_mode = #tpu.pipeline_mode<synchronous>, transform_indices = @transform_7, window_bounds = array<i64: 20, 1>}, {pipeline_mode = #tpu.pipeline_mode<synchronous>, transform_indices = @transform_8, window_bounds = array<i64: 10, 20>}, {pipeline_mode = #tpu.pipeline_mode<synchronous>, transform_indices = @transform_9, window_bounds = array<i64: 10, 1>}, {transform_indices = @transform_10, window_bounds = array<i64: 8, 512>}, {transform_indices = @transform_11, window_bounds = array<i64: 2, 512>}, {transform_indices = @transform_12, window_bounds = array<i64: 1, 512>}]} {
    %c0 = arith.constant 0 : index
    %c0_0 = arith.constant 0 : index
    %0 = vector.load %arg1[%c0, %c0_0] : memref<13x512xf32, #tpu.memory_space<vmem>>, vector<13x512xf32>
    %1 = vector.extract_strided_slice %0 {offsets = [0, 0], sizes = [8, 512], strides = [1, 1]} : vector<13x512xf32> to vector<8x512xf32>
    %2 = vector.extract_strided_slice %0 {offsets = [8, 0], sizes = [4, 512], strides = [1, 1]} : vector<13x512xf32> to vector<4x512xf32>
    %3 = vector.extract_strided_slice %0 {offsets = [12, 0], sizes = [1, 512], strides = [1, 1]} : vector<13x512xf32> to vector<1x512xf32>
    %c0_1 = arith.constant 0 : index
    %c0_2 = arith.constant 0 : index
    %4 = vector.load %arg2[%c0_1, %c0_2] : memref<75x512xf32, #tpu.memory_space<vmem>>, vector<5x512xf32>
    %cst = arith.constant dense<0xFF800000> : vector<512xf32>
    %5 = vector.multi_reduction <maximumf>, %4, %cst [0] : vector<5x512xf32> to vector<512xf32>
    %6 = vector.shape_cast %5 : vector<512xf32> to vector<1x512xf32>
    %c5 = arith.constant 5 : index
    %c0_3 = arith.constant 0 : index
    %7 = vector.load %arg2[%c5, %c0_3] : memref<75x512xf32, #tpu.memory_space<vmem>>, vector<5x512xf32>
    %cst_4 = arith.constant dense<0xFF800000> : vector<512xf32>
    %8 = vector.multi_reduction <maximumf>, %7, %cst_4 [0] : vector<5x512xf32> to vector<512xf32>
    %9 = vector.shape_cast %8 : vector<512xf32> to vector<1x512xf32>
    %c10 = arith.constant 10 : index
    %c0_5 = arith.constant 0 : index
    %10 = vector.load %arg2[%c10, %c0_5] : memref<75x512xf32, #tpu.memory_space<vmem>>, vector<5x512xf32>
    %cst_6 = arith.constant dense<0xFF800000> : vector<512xf32>
    %11 = vector.multi_reduction <maximumf>, %10, %cst_6 [0] : vector<5x512xf32> to vector<512xf32>
    %12 = vector.shape_cast %11 : vector<512xf32> to vector<1x512xf32>
    %c15 = arith.constant 15 : index
    %c0_7 = arith.constant 0 : index
    %13 = vector.load %arg2[%c15, %c0_7] : memref<75x512xf32, #tpu.memory_space<vmem>>, vector<5x512xf32>
    %cst_8 = arith.constant dense<0xFF800000> : vector<512xf32>
    %14 = vector.multi_reduction <maximumf>, %13, %cst_8 [0] : vector<5x512xf32> to vector<512xf32>
    %15 = vector.shape_cast %14 : vector<512xf32> to vector<1x512xf32>
    %c20 = arith.constant 20 : index
    %c0_9 = arith.constant 0 : index
    %16 = vector.load %arg2[%c20, %c0_9] : memref<75x512xf32, #tpu.memory_space<vmem>>, vector<5x512xf32>
    %cst_10 = arith.constant dense<0xFF800000> : vector<512xf32>
    %17 = vector.multi_reduction <maximumf>, %16, %cst_10 [0] : vector<5x512xf32> to vector<512xf32>
    %18 = vector.shape_cast %17 : vector<512xf32> to vector<1x512xf32>
    %c25 = arith.constant 25 : index
    %c0_11 = arith.constant 0 : index
    %19 = vector.load %arg2[%c25, %c0_11] : memref<75x512xf32, #tpu.memory_space<vmem>>, vector<5x512xf32>
    %cst_12 = arith.constant dense<0xFF800000> : vector<512xf32>
    %20 = vector.multi_reduction <maximumf>, %19, %cst_12 [0] : vector<5x512xf32> to vector<512xf32>
    %21 = vector.shape_cast %20 : vector<512xf32> to vector<1x512xf32>
    %c30 = arith.constant 30 : index
    %c0_13 = arith.constant 0 : index
    %22 = vector.load %arg2[%c30, %c0_13] : memref<75x512xf32, #tpu.memory_space<vmem>>, vector<5x512xf32>
    %cst_14 = arith.constant dense<0xFF800000> : vector<512xf32>
    %23 = vector.multi_reduction <maximumf>, %22, %cst_14 [0] : vector<5x512xf32> to vector<512xf32>
    %24 = vector.shape_cast %23 : vector<512xf32> to vector<1x512xf32>
    %c35 = arith.constant 35 : index
    %c0_15 = arith.constant 0 : index
    %25 = vector.load %arg2[%c35, %c0_15] : memref<75x512xf32, #tpu.memory_space<vmem>>, vector<5x512xf32>
    %cst_16 = arith.constant dense<0xFF800000> : vector<512xf32>
    %26 = vector.multi_reduction <maximumf>, %25, %cst_16 [0] : vector<5x512xf32> to vector<512xf32>
    %27 = vector.shape_cast %26 : vector<512xf32> to vector<1x512xf32>
    %28 = tpu.concatenate %6, %9, %12, %15, %18, %21, %24, %27 in 0 : vector<1x512xf32>, vector<1x512xf32>, vector<1x512xf32>, vector<1x512xf32>, vector<1x512xf32>, vector<1x512xf32>, vector<1x512xf32>, vector<1x512xf32> -> vector<8x512xf32>
    %29 = arith.addf %1, %28 : vector<8x512xf32>
    %c0_17 = arith.constant 0 : index
    %c0_18 = arith.constant 0 : index
    %30 = vector.load %arg11[%c0_17, %c0_18] : memref<8x512xf32, #tpu.memory_space<vmem>>, vector<8x512xf32>
    tpu.vector_store %arg11[%c0_17, %c0_18], %29 {strides = array<i32>} : memref<8x512xf32, #tpu.memory_space<vmem>>, vector<8x512xf32>,
    %c70 = arith.constant 70 : index
    %c0_19 = arith.constant 0 : index
    %31 = vector.load %arg2[%c70, %c0_19] : memref<75x512xf32, #tpu.memory_space<vmem>>, vector<5x512xf32>
    %cst_20 = arith.constant dense<0xFF800000> : vector<512xf32>
    %32 = vector.multi_reduction <maximumf>, %31, %cst_20 [0] : vector<5x512xf32> to vector<512xf32>
    %33 = vector.shape_cast %32 : vector<512xf32> to vector<1x512xf32>
    %34 = arith.addf %3, %33 : vector<1x512xf32>
    %35 = arith.negf %34 : vector<1x512xf32>
    %36 = math.exp %35 : vector<1x512xf32>
    %cst_21 = arith.constant 1.000000e+00 : f32
    %37 = vector.broadcast %cst_21 : f32 to vector<1x512xf32>
    %38 = arith.addf %37, %36 : vector<1x512xf32>
    %39 = arith.divf %37, %38 : vector<1x512xf32>
    %c0_22 = arith.constant 0 : index
    %c0_23 = arith.constant 0 : index
    %40 = vector.load %arg13[%c0_22, %c0_23] : memref<1x512xf32, #tpu.memory_space<vmem>>, vector<1x512xf32>
    tpu.vector_store %arg13[%c0_22, %c0_23], %39 {strides = array<i32>} : memref<1x512xf32, #tpu.memory_space<vmem>>, vector<1x512xf32>,
    %c40 = arith.constant 40 : index
    %c0_24 = arith.constant 0 : index
    %41 = vector.load %arg2[%c40, %c0_24] : memref<75x512xf32, #tpu.memory_space<vmem>>, vector<20x512xf32>
    %c0_25 = arith.constant 0 : index
    %c0_26 = arith.constant 0 : index
    %42 = vector.load %arg3[%c0_25, %c0_26] : memref<20x4xf32, #tpu.memory_space<vmem>>, vector<20x4xf32>
    %cst_27 = arith.constant dense<0.000000e+00> : vector<20x512xf32>
    %43 = tpu.matmul %42, %2, %cst_27 {dimension_numbers = #tpu.dot_dimension_numbers<[1], [0], [0], [1], [0, 0, 1, 1], [], []>} : vector<20x4xf32>, vector<4x512xf32>, vector<20x512xf32> -> vector<20x512xf32>
    %44 = arith.subf %43, %41 : vector<20x512xf32>
    %cst_28 = arith.constant 0.000000e+00 : f32
    %45 = vector.broadcast %cst_28 : f32 to vector<20x512xf32>
    %46 = arith.maximumf %44, %45 : vector<20x512xf32>
    %c0_29 = arith.constant 0 : index
    %c0_30 = arith.constant 0 : index
    %47 = vector.load %arg5[%c0_29, %c0_30] : memref<25x20xf32, #tpu.memory_space<vmem>>, vector<25x20xf32>
    %c0_31 = arith.constant 0 : index
    %c0_32 = arith.constant 0 : index
    %48 = vector.load %arg6[%c0_31, %c0_32] : memref<25x1xf32, #tpu.memory_space<vmem>>, vector<25x1xf32>
    %cst_33 = arith.constant dense<0.000000e+00> : vector<25x512xf32>
    %49 = tpu.matmul %47, %46, %cst_33 {dimension_numbers = #tpu.dot_dimension_numbers<[1], [0], [0], [1], [0, 0, 1, 1], [], []>} : vector<25x20xf32>, vector<20x512xf32>, vector<25x512xf32> -> vector<25x512xf32>
    %50 = vector.broadcast %48 : vector<25x1xf32> to vector<25x512xf32>
    %51 = arith.addf %49, %50 : vector<25x512xf32>
    %cst_34 = arith.constant 0.000000e+00 : f32
    %52 = vector.broadcast %cst_34 : f32 to vector<25x512xf32>
    %53 = arith.maximumf %51, %52 : vector<25x512xf32>
    %c0_35 = arith.constant 0 : index
    %c0_36 = arith.constant 0 : index
    %54 = vector.load %arg7[%c0_35, %c0_36] : memref<20x25xf32, #tpu.memory_space<vmem>>, vector<20x25xf32>
    %c0_37 = arith.constant 0 : index
    %c0_38 = arith.constant 0 : index
    %55 = vector.load %arg8[%c0_37, %c0_38] : memref<20x1xf32, #tpu.memory_space<vmem>>, vector<20x1xf32>
    %cst_39 = arith.constant dense<0.000000e+00> : vector<20x512xf32>
    %56 = tpu.matmul %54, %53, %cst_39 {dimension_numbers = #tpu.dot_dimension_numbers<[1], [0], [0], [1], [0, 0, 1, 1], [], []>} : vector<20x25xf32>, vector<25x512xf32>, vector<20x512xf32> -> vector<20x512xf32>
    %57 = vector.broadcast %55 : vector<20x1xf32> to vector<20x512xf32>
    %58 = arith.addf %56, %57 : vector<20x512xf32>
    %cst_40 = arith.constant 0.000000e+00 : f32
    %59 = vector.broadcast %cst_40 : f32 to vector<20x512xf32>
    %60 = arith.maximumf %58, %59 : vector<20x512xf32>
    %c0_41 = arith.constant 0 : index
    %c0_42 = arith.constant 0 : index
    %61 = vector.load %arg9[%c0_41, %c0_42] : memref<10x20xf32, #tpu.memory_space<vmem>>, vector<10x20xf32>
    %c0_43 = arith.constant 0 : index
    %c0_44 = arith.constant 0 : index
    %62 = vector.load %arg10[%c0_43, %c0_44] : memref<10x1xf32, #tpu.memory_space<vmem>>, vector<10x1xf32>
    %cst_45 = arith.constant dense<0.000000e+00> : vector<10x512xf32>
    %63 = tpu.matmul %61, %60, %cst_45 {dimension_numbers = #tpu.dot_dimension_numbers<[1], [0], [0], [1], [0, 0, 1, 1], [], []>} : vector<10x20xf32>, vector<20x512xf32>, vector<10x512xf32> -> vector<10x512xf32>
    %64 = vector.broadcast %62 : vector<10x1xf32> to vector<10x512xf32>
    %65 = arith.addf %63, %64 : vector<10x512xf32>
    %c60 = arith.constant 60 : index
    %c0_46 = arith.constant 0 : index
    %66 = vector.load %arg2[%c60, %c0_46] : memref<75x512xf32, #tpu.memory_space<vmem>>, vector<10x512xf32>
    %c0_47 = arith.constant 0 : index
    %c0_48 = arith.constant 0 : index
    %67 = vector.load %arg4[%c0_47, %c0_48] : memref<2x10xf32, #tpu.memory_space<vmem>>, vector<2x10xf32>
    %68 = arith.addf %65, %66 : vector<10x512xf32>
    %cst_49 = arith.constant dense<0.000000e+00> : vector<2x512xf32>
    %69 = tpu.matmul %67, %68, %cst_49 {dimension_numbers = #tpu.dot_dimension_numbers<[1], [0], [0], [1], [0, 0, 1, 1], [], []>} : vector<2x10xf32>, vector<10x512xf32>, vector<2x512xf32> -> vector<2x512xf32>
    %c0_50 = arith.constant 0 : index
    %c0_51 = arith.constant 0 : index
    %70 = vector.load %arg12[%c0_50, %c0_51] : memref<2x512xf32, #tpu.memory_space<vmem>>, vector<2x512xf32>
    tpu.vector_store %arg12[%c0_50, %c0_51], %69 {strides = array<i32>} : memref<2x512xf32, #tpu.memory_space<vmem>>, vector<2x512xf32>,
    return
  }
  func.func @transform_0(%arg0: i32) -> (i32, i32) {
    %c0_i32 = arith.constant 0 : i32
    %c0_i32_0 = arith.constant 0 : i32
    return %c0_i32, %arg0 : i32, i32
  }
  func.func @transform_1(%arg0: i32) -> (i32, i32) {
    %c0_i32 = arith.constant 0 : i32
    %c0_i32_0 = arith.constant 0 : i32
    return %c0_i32, %arg0 : i32, i32
  }
  func.func @transform_2(%arg0: i32) -> (i32, i32) {
    %c0_i32 = arith.constant 0 : i32
    %c0_i32_0 = arith.constant 0 : i32
    %c0_i32_1 = arith.constant 0 : i32
    return %c0_i32, %c0_i32_0 : i32, i32
  }
  func.func @transform_3(%arg0: i32) -> (i32, i32) {
    %c0_i32 = arith.constant 0 : i32
    %c0_i32_0 = arith.constant 0 : i32
    %c0_i32_1 = arith.constant 0 : i32
    return %c0_i32, %c0_i32_0 : i32, i32
  }
  func.func @transform_4(%arg0: i32) -> (i32, i32) {
    %c0_i32 = arith.constant 0 : i32
    %c0_i32_0 = arith.constant 0 : i32
    %c0_i32_1 = arith.constant 0 : i32
    return %c0_i32, %c0_i32_0 : i32, i32
  }
  func.func @transform_5(%arg0: i32) -> (i32, i32) {
    %c0_i32 = arith.constant 0 : i32
    %c0_i32_0 = arith.constant 0 : i32
    %c0_i32_1 = arith.constant 0 : i32
    return %c0_i32, %c0_i32_0 : i32, i32
  }
  func.func @transform_6(%arg0: i32) -> (i32, i32) {
    %c0_i32 = arith.constant 0 : i32
    %c0_i32_0 = arith.constant 0 : i32
    %c0_i32_1 = arith.constant 0 : i32
    return %c0_i32, %c0_i32_0 : i32, i32
  }
  func.func @transform_7(%arg0: i32) -> (i32, i32) {
    %c0_i32 = arith.constant 0 : i32
    %c0_i32_0 = arith.constant 0 : i32
    %c0_i32_1 = arith.constant 0 : i32
    return %c0_i32, %c0_i32_0 : i32, i32
  }
  func.func @transform_8(%arg0: i32) -> (i32, i32) {
    %c0_i32 = arith.constant 0 : i32
    %c0_i32_0 = arith.constant 0 : i32
    %c0_i32_1 = arith.constant 0 : i32
    return %c0_i32, %c0_i32_0 : i32, i32
  }
  func.func @transform_9(%arg0: i32) -> (i32, i32) {
    %c0_i32 = arith.constant 0 : i32
    %c0_i32_0 = arith.constant 0 : i32
    %c0_i32_1 = arith.constant 0 : i32
    return %c0_i32, %c0_i32_0 : i32, i32
  }
  func.func @transform_10(%arg0: i32) -> (i32, i32) {
    %c0_i32 = arith.constant 0 : i32
    %c0_i32_0 = arith.constant 0 : i32
    return %c0_i32, %arg0 : i32, i32
  }
  func.func @transform_11(%arg0: i32) -> (i32, i32) {
    %c0_i32 = arith.constant 0 : i32
    %c0_i32_0 = arith.constant 0 : i32
    return %c0_i32, %arg0 : i32, i32
  }
  func.func @transform_12(%arg0: i32) -> (i32, i32) {
    %c0_i32 = arith.constant 0 : i32
    %c0_i32_0 = arith.constant 0 : i32
    return %c0_i32, %arg0 : i32, i32
  }
}

</mosaic_0001>

<bundles_post_ra>
// kernel: edgeconv_forward.2
= control target key start
LH: loop header
LB: loop body
LE: loop exit
PB: predicated region body
PF: predicated region fallthrough
CT: control target
= control target key end

     0   :  { %s2311_s0 = inlined_call_operand.vmem [shape: f32[4,1024], index: 0, kind: input, shape index: {}]   ;;  %s2312_s1 = inlined_call_operand.vmem [shape: f32[2,1024], index: 1, kind: input, shape index: {}]   ;;  %s2313_s2 = inlined_call_operand.vmem [shape: f32[16,4], index: 2, kind: input, shape index: {}]   ;;  %s2314_s3 = inlined_call_operand.vmem [shape: f32[8,1], index: 3, kind: input, shape index: {}]   ;;  %s2315_s4 = inlined_call_operand.vmem [shape: f32[8,1], index: 4, kind: input, shape index: {}]   ;;  %s2316_s5 = inlined_call_operand.vmem [shape: f32[4,2], index: 5, kind: input, shape index: {}]   ;;  %s2317_s6 = inlined_call_operand.vmem [shape: f32[4,1], index: 6, kind: input, shape index: {}]   ;;  %s2318_s7 = inlined_call_operand.vmem [shape: f32[8,1], index: 7, kind: input, shape index: {}]   ;;  %s2319_s8 = inlined_call_operand.vmem [shape: f32[8,1], index: 8, kind: input, shape index: {}]   ;;  %s2320_s9 = inlined_call_operand.<no memory space> [shape: f32[1,1], index: 9, kind: input, shape index: {}]   ;;  %s2321_s10 = inlined_call_operand.vmem [shape: f32[4,2], index: 10, kind: input, shape index: {}]   ;;  %s2322_s11 = inlined_call_operand.vmem [shape: f32[4,1], index: 11, kind: input, shape index: {}]   ;;  %s2323_s12 = inlined_call_operand.vmem [shape: f32[5,4], index: 12, kind: input, shape index: {}]   ;;  %s2324_s13 = inlined_call_operand.vmem [shape: f32[5,1], index: 13, kind: input, shape index: {}]   ;;  %s2325_s14 = inlined_call_operand.hbm [shape: f32[4,5], index: 14, kind: input, shape index: {}]   ;;  %s2326_s15 = inlined_call_operand.vmem [shape: f32[4,1], index: 15, kind: input, shape index: {}]   ;;  %s2327_s16 = inlined_call_operand.hbm [shape: f32[2,4], index: 16, kind: input, shape index: {}]   ;;  %s2328_s17 = inlined_call_operand.vmem [shape: f32[2,1], index: 17, kind: input, shape index: {}]   ;;  %s2329_s18 = inlined_call_operand.vmem [shape: f32[13,1024], index: 18, kind: output, shape index: {0}]   ;;  %s2330_s19 = inlined_call_operand.vmem [shape: f32[15,1024], index: 19, kind: output, shape index: {1}]  }
   0x1   :  { %2335 = sst [smem:[#allocation14_spill]] %s2311_s0  ;;  %v25_v0 = vstv %s2320_s9 }
   0x2   :  { %2336 = sst [smem:[#allocation15_spill]] %s2312_s1  ;;  %26 = vst [vmem:[#allocation2] sm:$0x1] %v25_v0 }
   0x3   :  { %2337 = sst [smem:[#allocation16_spill]] %s2313_s2 }
   0x4   :  { %2338 = sst [smem:[#allocation17_spill]] %s2314_s3 }
   0x5   :  { %2339 = sst [smem:[#allocation18_spill]] %s2325_s14 }
   0x6   :  { %2340 = sst [smem:[#allocation19_spill]] %s2327_s16 }
   0x7   :  { %27 = vsyncpa [#allocation4], 0 }
   0x8   :  { %28 = vsyncpa [#allocation6], 0  ;;  %s1983_s20 = smov 0   ;;  %s1985_s21 = smov 0  }
   0x9   :  { %s1987_s1 = smov 0  }
   0xa LB: > { %2341 = sst [smem:[#allocation11_spill]] %s1871_s21  ;;  %s1996_s9 = sadd.s32 4294967295, %s1875_s1   ;;  %s1875_s1 = sphi %s1987_s1, %s2352_s1   ;;  %s1871_s21 = sphi %s1985_s21, %s2354_s21   ;;  %s1867_s20 = sphi %s1983_s20, %s2353_s20  }
   0xb   : > { %s1998_s22 = sadd.s32 1, %s1875_s1   ;;  %s429_s23 = sadd.s32 1, %s1871_s21 }
   0xc   : > { %2342 = sst [smem:[#allocation12_spill]] %s1998_s22  ;;  %s426_s2 = ssub.s32 %s1875_s1, %s1998_s22 }
   0xd   : > { %p427_p0 = scmp.eq.s32.totalorder %s426_s2, 0  ;;  %p439_p1 = scmp.ne.s32.totalorder %s1871_s21, %s1867_s20 }
   0xe   : > { %p440_p2 = scmp.eq.s32.totalorder %s1996_s9, 1  ;;  %p1661_p3 = scmp.ge.s32.totalorder %s1875_s1, 1 }
   0xf   : > { %s2006_s24 = scalar_select %p427_p0, %s1871_s21, %s429_s23  }
  0x10   : > { %p2008_p4 = por %p440_p2, %p439_p1  ;;  %p479_p5 = scmp.lt.s32.totalorder %s1875_s1, 3 }
  0x11   : > { %2343 = sst [smem:[#allocation13_spill]] %s2006_s24  ;;  %p1751_p6 = scmp.eq.s32.totalorder %s1996_s9, 0 }
  0x12   : > { %p2013_p7 = pnand %p1661_p3, %p479_p5  ;;  %s2346_s14 = sld [smem:[#allocation18_spill]] }
  0x13   : > { %s1877_s29 = smov [#allocation3]   ;;  %s2347_s16 = sld [smem:[#allocation19_spill]] }
  0x14   : > { %p1744_p8 = pneg %p2013_p7  ;;  %s529_s0 = sshll.u32 %s1877_s29, 4  ;;  %s530_s0 = int_to_ptr.vmem [resolvable:$true] %s529_s0 }
  0x15   : > { %s1878_s1 = smov [#allocation5]  }
  0x16   : > { %p1745_p9 = pnand %p1751_p6, %p1744_p8  ;;  %s544_s24 = sshll.u32 %s1878_s1, 4  ;;  %s545_s24 = int_to_ptr.vmem [resolvable:$true] %s544_s24 }
  0x17   : > { %578 = sbr.rel (%p2013_p7) target bundleno = 636 (0x27c), region = 92 }
  0x18   : > { %s527_s28 = sshll.u32 %s2346_s14, 4  ;;  %s528_s28 = int_to_ptr.hbm [resolvable:$true] %s527_s28 }
  0x19   : > { %s542_s23 = sshll.u32 %s2347_s16, 4  ;;  %s543_s23 = int_to_ptr.hbm [resolvable:$true] %s542_s23 }
  0x1a   : > { %1747 = dma.hbm_to_vmem [thread:$0]  (!%p1745_p9), %s528_s28, 64, %s530_s0, [#allocation4]  }
  0x1b   : > { %1750 = dma.hbm_to_vmem [thread:$0]  (!%p1745_p9), %s543_s23, 32, %s545_s24, [#allocation6]  }
  0x1c   : > { %1858 = dma.done.wait (%p1751_p6), [#allocation4], 64  }
  0x1d   : > { %1860 = vsyncadd (%p1751_p6), [#allocation4], 4294967232 }
  0x1e   : > { %1862 = dma.done.wait (%p1751_p6), [#allocation6], 32  }
  0x1f   : > { %1864 = vsyncadd (%p1751_p6), [#allocation6], 4294967264  ;;  %s1670_s26 = sshll.u32 %s1996_s9, 2  ;;  %v1879_v1 = vmov 0   ;;  %s2348_s28 = sld [smem:[#allocation14_spill]]  ;;  %v1317_v6 = vld [vmem:[%s2318_s7] sm:$0xff] }
  0x20   : > { %1782 = vset.pattern.permute.xlu0 %v1879_v1  ;;  %p649_p10 = scmp.lt.s32.totalorder %s1670_s26, 7  ;;  %1783 = vset.pattern.permute.xlu1 %v1879_v1  ;;  %v895_v2 = vld [vmem:[%s2322_s11] sm:$0xf]  ;;  %s2349_s21 = sld [smem:[#allocation15_spill]]  ;;  %vm683_vm0 = vcmask 1043456   ;;  %vm676_vm1 = vcmask 31744  }
  0x21   : > { %1784 = vset.pattern.permute.xlu2 %v1879_v1  ;;  %898 = vperm.xlu0 %1782, %v895_v2   ;;  %v1108_v5 = vld [vmem:[%s2326_s15] sm:$0xf]  ;;  %vm805_vm2 = vcmask 1041408   ;;  %v1385_v22 = vld [vmem:[#allocation2] sm:$0x1]  ;;  %vm801_vm3 = vcmask 15360  }
  0x22   : > { %s2356_s26 = smov (!%p649_p10, %s1670_s26), 7  ;;  %1111 = vperm.xlu1 %1783, %v1108_v5   ;;  %1320 = vperm.xlu2 %1784, %v1317_v6   ;;  %v1002_v13 = vld [vmem:[%s2324_s13] sm:$0x1f]  ;;  %s639_s0 = sand.u32 1, %s1867_s20   ;;  %vm1118_vm4 = vcmask 1044480   ;;  %vm1114_vm5 = vcmask 39936  }
  0x23   : > { %s1671_s24 = sshll.u32 %s2356_s26, 2  ;;  %s1673_s2 = sshll.u32 %s2356_s26, 1  ;;  %v1351_v15 = vld [vmem:[%s2319_s8] sm:$0xff]  ;;  %vm1452_vm6 = vcmask 1045504  }
  0x24   : > { %s2350_s26 = sld [smem:[#allocation16_spill]]  ;;  %v1216_v17 = vld [vmem:[%s2328_s17] sm:$0x3]  ;;  %s2124_s30 = sshll.u32 %s639_s0, 6 }
  0x25   : > { %s652_s29 = scalar_lea.vmem %s2348_s28, %s1671_s24  ;;  %v1410_v23 = vld [vmem:[%s2317_s6] sm:$0xf]  ;;  %s2135_s20 = scalar_lea.vmem [#allocation7], %s2124_s30 }
  0x26   : > { %v662_v3 = vld [vmem:[%s652_s29] sm:$0xff]  ;;  %v663_v4 = vld [vmem:[%s652_s29 + $0x8] sm:$0xff]  ;;  %s658_s22 = scalar_lea.vmem %s2349_s21, %s1673_s2  ;;  %s2351_s29 = sld [smem:[#allocation17_spill]] }
  0x27   : > { %669 = vst [vmem:[#allocation1] ss:$2 sm:$0xff] %v662_v3  ;;  %v664_v7 = vld [vmem:[%s658_s22] sm:$0xff]  ;;  %s2150_s2 = scalar_lea.vmem [#allocation8], %s2124_s30  ;;  %s1734_s24 = sshll.u32 (%p2008_p4), %s1996_s9, 5 }
  0x28   : > { %671 = vst [vmem:[#allocation1 + $0x10] ss:$2 sm:$0xff] %v663_v4  ;;  %v794_v24 = vld [vmem:[%s2316_s5] sm:$0xf]  ;;  %s1478_s28 = scalar_lea.vmem (%p2008_p4), %s2329_s18, %s1734_s24 }
  0x29   : > { %1005 = vperm.xlu0 %1782, %v1002_v13   ;;  %v1400_v25 = vld [vmem:[%s2315_s4] sm:$0xff] }
  0x2a   : > { %v665_v8 = vld [vmem:[%s2350_s26] sm:$0xff]  ;;  %1354 = vperm.xlu2 %1784, %v1351_v15   ;;  %v666_v16 = vld [vmem:[%s2350_s26 + $0x8] sm:$0xff] }
  0x2b   : > { %v894_v30 = vld [vmem:[%s2321_s10] sm:$0xf] }
  0x2c   : > { %v784_v14 = vld [vmem:[%s2351_s29] sm:$0xff] }
  0x2d   : > { %787 = vperm.xlu1 %1783, %v784_v14  }
  0x2e   : > { %v672_v9 = vld.sshfl [vmem:[#allocation1] sm:$0xff pattern:$0x75316420]  ;;  %v673_v10 = vld.sshfl [vmem:[#allocation1 + $0x8] sm:$0xff pattern:$0x75316420] }
  0x2f   : > { %1674 = vmatpush.msk.msra.mxu0 %vm683_vm0, %v672_v9  ;;  %1677 = vmatpush.msk.msra.mxu1 %vm683_vm0, %v673_v10  ;;  %v674_v11 = vld.sshfl [vmem:[#allocation1 + $0x10] sm:$0xff pattern:$0x75316420]  ;;  %v675_v12 = vld.sshfl [vmem:[#allocation1 + $0x18] sm:$0xff pattern:$0x75316420] }
  0x30   : > { %1680 = vmatpush.msk.msra.mxu2 %vm683_vm0, %v674_v11  ;;  %1683 = vmatpush.msk.msra.mxu3 %vm683_vm0, %v675_v12  ;;  %796 = vst [vmem:[#allocation1] ss:$4 sm:$0xff] %v664_v7 }
  0x31   : > { %1675 = vmatmul.msk.f32.vlgmr.msra.gmra.mxu0 %vm676_vm1, %v665_v8  ;;  %1678 = vmatmul.msk.f32.vlgmr.msra.gmra.mxu1 %vm676_vm1, %v665_v8 }
  0x32   : > { %1681 = vmatmul.msk.f32.vlgmr.msra.gmra.mxu2 %vm676_vm1, %v665_v8  ;;  %1684 = vmatmul.msk.f32.vlgmr.msra.gmra.mxu3 %vm676_vm1, %v665_v8 }
  0x33   : > { %1219 = vperm.xlu0 %1782, %v1216_v17   ;;  %1413 = vperm.xlu2 %1784, %v1410_v23  }
  0x35   : > { %1388 = vperm.xlu1 %1783, %v1385_v22  }
  0x37   : > { %v799_v18 = vld.sshfl [vmem:[#allocation1 + $0x10] sm:$0xff pattern:$0x73625140]  ;;  %v800_v19 = vld.sshfl [vmem:[#allocation1 + $0x18] sm:$0xff pattern:$0x73625140] }
  0x38   : > { %1690 = vmatpush.msk.msrb.mxu2 %vm805_vm2, %v799_v18  ;;  %1692 = vmatpush.msk.msrb.mxu3 %vm805_vm2, %v800_v19  ;;  %v797_v20 = vld.sshfl [vmem:[#allocation1] sm:$0xff pattern:$0x73625140]  ;;  %v798_v21 = vld.sshfl [vmem:[#allocation1 + $0x8] sm:$0xff pattern:$0x73625140] }
  0x39   : > { %1676 = vmatmul.msk.f32.gmra.mxu0 %vm676_vm1, %v666_v16  ;;  %1679 = vmatmul.msk.f32.gmra.mxu1 %vm676_vm1, %v666_v16  ;;  %901 = vst [vmem:[#allocation1] ss:$4 sm:$0xff] %v664_v7 }
  0x3a   : > { %1682 = vmatmul.msk.f32.gmra.mxu2 %vm676_vm1, %v666_v16  ;;  %1685 = vmatmul.msk.f32.gmra.mxu3 %vm676_vm1, %v666_v16 }
  0x3b   : > { %1686 = vmatpush.msk.msrb.mxu0 %vm805_vm2, %v797_v20  ;;  %1688 = vmatpush.msk.msrb.mxu1 %vm805_vm2, %v798_v21 }
  0x3c   : > { %1403 = vperm.xlu0 %1782, %v1400_v25  }
  0x40   : > { %v902_v26 = vld.sshfl [vmem:[#allocation1] sm:$0xff pattern:$0x73625140]  ;;  %v903_v27 = vld.sshfl [vmem:[#allocation1 + $0x8] sm:$0xff pattern:$0x73625140] }
  0x41   : > { %1687 = vmatmul.msk.f32.vlgmr.msrb.gmra.mxu0 %vm801_vm3, %v794_v24  ;;  %1689 = vmatmul.msk.f32.vlgmr.msrb.gmra.mxu1 %vm801_vm3, %v794_v24  ;;  %v904_v28 = vld.sshfl [vmem:[#allocation1 + $0x10] sm:$0xff pattern:$0x73625140]  ;;  %v905_v29 = vld.sshfl [vmem:[#allocation1 + $0x18] sm:$0xff pattern:$0x73625140] }
  0x42   : > { %1691 = vmatmul.msk.f32.vlgmr.msrb.gmra.mxu2 %vm801_vm3, %v794_v24  ;;  %1693 = vmatmul.msk.f32.vlgmr.msrb.gmra.mxu3 %vm801_vm3, %v794_v24 }
  0x43   : > { %1694 = vmatpush.msk.msra.mxu0 %vm805_vm2, %v902_v26  ;;  %1696 = vmatpush.msk.msra.mxu1 %vm805_vm2, %v903_v27 }
  0x44   : > { %1698 = vmatpush.msk.msra.mxu2 %vm805_vm2, %v904_v28  ;;  %1700 = vmatpush.msk.msra.mxu3 %vm805_vm2, %v905_v29 }
  0x49   : > { %1695 = vmatmul.msk.f32.vlgmr.msra.gmra.mxu0 %vm801_vm3, %v894_v30  ;;  %1697 = vmatmul.msk.f32.vlgmr.msra.gmra.mxu1 %vm801_vm3, %v894_v30 }
  0x4a   : > { %1699 = vmatmul.msk.f32.vlgmr.msra.gmra.mxu2 %vm801_vm3, %v894_v30  ;;  %1701 = vmatmul.msk.f32.vlgmr.msra.gmra.mxu3 %vm801_vm3, %v894_v30 }
  0x7c   : > { %v1321_v34 = vpop.permute.xlu2 %1320 }
  0x84   : > { %v2122_v45 = vpop.permute.xlu2 %1354 }
  0x8d   : > { %v1414_v19 = vpop.permute.xlu2 %1413 }
  0x93   : > { %v2111_v31 = vpop.permute.xlu0 %898 }
  0x94   : > { %v2113_v32 = vpop.permute.xlu1 %1111 }
  0x9b   : > { %v2115_v33 = vpop.permute.xlu0 %1005 }
  0x9f   : > { %v2117_v35 = vpop.permute.xlu1 %787 }
  0xa5   : > { %v2119_v36 = vpop.permute.xlu0 %1219 }
  0xa7   : > { %v1389_v46 = vpop.permute.xlu1 %1388 }
  0xa8   : > { %v1391_v4 = vperm.slane %v1389_v46, 0 }
  0xae   : > { %v709_v37 = vpop.f32.mrf.mxu0  ;;  %v732_v38 = vpop.f32.mrf.mxu1 }
  0xaf   : > { %v1323_v39 = vmul.f32 %v1321_v34, %v709_v37  ;;  %v1324_v40 = vmul.f32 %v1321_v34, %v732_v38  ;;  %v1404_v49 = vpop.permute.xlu0 %1403 }
  0xb0   : > { %v1406_v51 = vadd.f32 %v1404_v49, %v709_v37  ;;  %v1407_v52 = vadd.f32 %v1404_v49, %v732_v38 }
  0xb1   : > { %v1327_v41 = vrot.slane %v1323_v39, 4  ;;  %v1333_v42 = vrot.slane %v1324_v40, 4 }
  0xb2   : > { %1424 = vst [vmem:[%s2135_s20] sm:$0xff] %v1406_v51 }
  0xb3   : > { %v1328_v43 = vadd.f32 %v1327_v41, %v1323_v39  ;;  %v1334_v44 = vadd.f32 %v1333_v42, %v1324_v40  ;;  %1425 = vst [vmem:[%s2135_s20 + $0x8] sm:$0xff] %v1407_v52 }
  0xb5   : > { %v1329_v47 = vrot.slane %v1328_v43, 2  ;;  %v1335_v48 = vrot.slane %v1334_v44, 2  ;;  %v2126_v50 = vpop.f32.mrf.mxu2  ;;  %v2130_v55 = vpop.f32.mrf.mxu3 }
  0xb6   : > { %v1325_v53 = vmul.f32 %v1321_v34, %v2126_v50  ;;  %v1408_v54 = vadd.f32 %v1404_v49, %v2126_v50  ;;  %v712_v56 = vpop.f32.mrf.mxu0  ;;  %v1326_v59 = vmul.f32 %v1321_v34, %v2130_v55  ;;  %v1409_v60 = vadd.f32 %v1404_v49, %v2130_v55  ;;  %v735_v61 = vpop.f32.mrf.mxu1 }
  0xb7   : > { %v1330_v57 = vadd.f32 %v1329_v47, %v1328_v43  ;;  %v1336_v58 = vadd.f32 %v1335_v48, %v1334_v44  ;;  %v790_v63 = vadd.f32 %v2117_v35, %v712_v56  ;;  %v791_v0 = vadd.f32 %v2117_v35, %v735_v61 }
  0xb8   : > { %v1339_v62 = vrot.slane %v1325_v53, 4  ;;  %v1345_v1 = vrot.slane %v1326_v59, 4  ;;  %1426 = vst [vmem:[%s2135_s20 + $0x10] sm:$0xff] %v1408_v54 }
  0xb9   : > { %v1331_v2 = vrot.slane %v1330_v57, 1  ;;  %v1337_v3 = vrot.slane %v1336_v58, 1  ;;  %v1432_v6 = vsub.f32 %v790_v63, %v709_v37  ;;  %v1433_v7 = vsub.f32 %v791_v0, %v732_v38  ;;  %1427 = vst [vmem:[%s2135_s20 + $0x18] sm:$0xff] %v1409_v60 }
  0xba   : > { %v1340_v5 = vadd.f32 %v1339_v62, %v1325_v53  ;;  %v1357_v8 = vmul.f32 %v2122_v45, %v790_v63  ;;  %v1346_v9 = vadd.f32 %v1345_v1, %v1326_v59  ;;  %v1358_v10 = vmul.f32 %v2122_v45, %v791_v0 }
  0xbb   : > { %v2145_v11 = vadd.f32 %v1331_v2, %v1330_v57  ;;  %v2147_v12 = vadd.f32 %v1337_v3, %v1336_v58  ;;  %1457 = vst [vmem:[%s2150_s2] sm:$0xff] %v1432_v6 }
  0xbc   : > { %v1341_v13 = vrot.slane %v1340_v5, 2  ;;  %v1361_v14 = vrot.slane %v1357_v8, 4  ;;  %v1347_v15 = vrot.slane %v1346_v9, 2  ;;  %1458 = vst [vmem:[%s2150_s2 + $0x8] sm:$0xff] %v1433_v7  ;;  %v1367_v16 = vrot.slane %v1358_v10, 4 }
  0xbd   : > { %v758_v17 = vpop.f32.mrf.mxu2  ;;  %v1392_v18 = vadd.f32 %v1391_v4, %v2145_v11  ;;  %v781_v23 = vpop.f32.mrf.mxu3  ;;  %v1393_v25 = vadd.f32 %v1391_v4, %v2147_v12 }
  0xbe   : > { %v1342_v20 = vadd.f32 %v1341_v13, %v1340_v5  ;;  %v1362_v21 = vadd.f32 %v1361_v14, %v1357_v8  ;;  %v792_v22 = vadd.f32 %v2117_v35, %v758_v17  ;;  %v2156_v24 = vpop.f32.mrf.mxu0  ;;  %v1348_v26 = vadd.f32 %v1347_v15, %v1346_v9  ;;  %v2160_v29 = vpop.f32.mrf.mxu1  ;;  %v1001_v15 = vld [vmem:[%s2323_s12] sm:$0x1f] }
  0xbf   : > { %v1368_v27 = vadd.f32 %v1367_v16, %v1358_v10  ;;  %v793_v28 = vadd.f32 %v2117_v35, %v781_v23  ;;  %v1416_v30 = vadd.f32 %v1414_v19, %v2156_v24  ;;  %v1417_v47 = vadd.f32 %v1414_v19, %v2160_v29 }
  0xc0   : > { %v1343_v34 = vrot.slane %v1342_v20, 1  ;;  %v1363_v37 = vrot.slane %v1362_v21, 2  ;;  %v1359_v38 = vmul.f32 %v2122_v45, %v792_v22  ;;  %v1434_v39 = vsub.f32 %v792_v22, %v2126_v50 }
  0xc1   : > { %v1349_v40 = vrot.slane %v1348_v26, 1  ;;  %v1369_v41 = vrot.slane %v1368_v27, 2  ;;  %v1360_v42 = vmul.f32 %v2122_v45, %v793_v28  ;;  %v1435_v43 = vsub.f32 %v793_v28, %v2130_v55 }
  0xc2   : > { %v2167_v44 = vadd.f32 %v1343_v34, %v1342_v20  ;;  %v1364_v35 = vadd.f32 %v1363_v37, %v1362_v21  ;;  %v1373_v46 = vrot.slane %v1359_v38, 4  ;;  %1459 = vst [vmem:[%s2150_s2 + $0x10] sm:$0xff] %v1434_v39  ;;  %v1420_v50 = vsel %vm683_vm0, %v1416_v30, %v1392_v18 }
  0xc3   : > { %v2171_v48 = vadd.f32 %v1349_v40, %v1348_v26  ;;  %v1370_v49 = vadd.f32 %v1369_v41, %v1368_v27  ;;  %v1379_v51 = vrot.slane %v1360_v42, 4  ;;  %1460 = vst [vmem:[%s2150_s2 + $0x18] sm:$0xff] %v1435_v43  ;;  %v1421_v45 = vsel %vm683_vm0, %v1417_v47, %v1393_v25  ;;  %v1107_v41 = vld [vmem:[#allocation3] sm:$0xf] }
  0xc4   : > { %v1365_v52 = vrot.slane %v1364_v35, 1  ;;  %v1374_v53 = vadd.f32 %v1373_v46, %v1359_v38  ;;  %1428 = vst [vmem:[%s2135_s20 + $0x20] sm:$0x1f] %v1420_v50  ;;  %v1394_v56 = vadd.f32 %v1391_v4, %v2167_v44 }
  0xc5   : > { %v1371_v54 = vrot.slane %v1370_v49, 1  ;;  %v1380_v55 = vadd.f32 %v1379_v51, %v1360_v42  ;;  %1429 = vst [vmem:[%s2135_s20 + $0x28] sm:$0x1f] %v1421_v45  ;;  %v2179_v57 = vpop.f32.mrf.mxu2  ;;  %v1395_v60 = vadd.f32 %v1391_v4, %v2171_v48  ;;  %v2185_v62 = vpop.f32.mrf.mxu3 }
  0xc6   : > { %v2181_v58 = vadd.f32 %v1365_v52, %v1364_v35  ;;  %v1375_v59 = vrot.slane %v1374_v53, 2  ;;  %v1418_v61 = vadd.f32 %v1414_v19, %v2179_v57  ;;  %v934_v63 = vpop.f32.mrf.mxu0  ;;  %v1419_v2 = vadd.f32 %v1414_v19, %v2185_v62  ;;  %v954_v5 = vpop.f32.mrf.mxu1 }
  0xc7   : > { %v2187_v0 = vadd.f32 %v1371_v54, %v1370_v49  ;;  %v1381_v1 = vrot.slane %v1380_v55, 2  ;;  %v935_v3 = vadd.f32 %v934_v63, %v2111_v31  ;;  %v955_v8 = vadd.f32 %v954_v5, %v2111_v31  ;;  %v1215_v54 = vld [vmem:[#allocation5] sm:$0x3] }
  0xc8   : > { %v1376_v6 = vadd.f32 %v1375_v59, %v1374_v53  ;;  %v1396_v7 = vsub.f32 %v2181_v58, %v2145_v11  ;;  %v1422_v4 = vsel %vm683_vm0, %v1418_v61, %v1394_v56  ;;  %v1423_v13 = vsel %vm683_vm0, %v1419_v2, %v1395_v60 }
  0xc9   : > { %v1382_v9 = vadd.f32 %v1381_v1, %v1380_v55  ;;  %v1397_v10 = vsub.f32 %v2187_v0, %v2147_v12  ;;  %1430 = vst [vmem:[%s2135_s20 + $0x30] sm:$0x1f] %v1422_v4  ;;  %v997_v14 = vmax.f32 %v935_v3, 0.0  ;;  %v998_v17 = vmax.f32 %v955_v8, 0.0 }
  0xca   : > { %v1377_v16 = vrot.slane %v1376_v6, 1  ;;  %1431 = vst [vmem:[%s2135_s20 + $0x38] sm:$0x1f] %v1423_v13 }
  0xcb   : > { %v1383_v18 = vrot.slane %v1382_v9, 1  ;;  %1702 = vmatpush.msk.msrb.mxu0 %vm683_vm0, %v997_v14  ;;  %1704 = vmatpush.msk.msrb.mxu1 %vm683_vm0, %v998_v17 }
  0xcc   : > { %v2204_v19 = vadd.f32 %v1377_v16, %v1376_v6  ;;  %1703 = vmatmul.msk.f32.vlgmr.msrb.gmra.mxu0 %vm676_vm1, %v1001_v15  ;;  %1705 = vmatmul.msk.f32.vlgmr.msrb.gmra.mxu1 %vm676_vm1, %v1001_v15 }
  0xcd   : > { %v2208_v20 = vadd.f32 %v1383_v18, %v1382_v9  ;;  %v974_v21 = vpop.f32.mrf.mxu2  ;;  %v994_v25 = vpop.f32.mrf.mxu3 }
  0xce   : > { %v1398_v22 = vsub.f32 %v2204_v19, %v2167_v44  ;;  %v975_v23 = vadd.f32 %v974_v21, %v2111_v31  ;;  %v995_v27 = vadd.f32 %v994_v25, %v2111_v31  ;;  %v1493_v44 = vld [vmem:[%s2135_s20 + $0x8] sm:$0xff] (%p2008_p4) }
  0xcf   : > { %v1399_v26 = vsub.f32 %v2208_v20, %v2171_v48  ;;  %v1495_v48 = vld [vmem:[%s2135_s20 + $0x10] sm:$0xff] (%p2008_p4)  ;;  %1494 = vst [vmem:[%s1478_s28 + $0x8] sm:$0xff] (%p2008_p4), %v1493_v44 }
  0xd0   : > { %v999_v28 = vmax.f32 %v975_v23, 0.0  ;;  %v1000_v30 = vmax.f32 %v995_v27, 0.0  ;;  %1496 = vst [vmem:[%s1478_s28 + $0x10] sm:$0xff] (%p2008_p4), %v1495_v48  ;;  %v1503_v17 = vld [vmem:[%s2135_s20 + $0x30] sm:$0xff] (%p2008_p4) }
  0xd1   : > { %v1505_v18 = vld [vmem:[%s2135_s20 + $0x38] sm:$0xff] (%p2008_p4)  ;;  %1504 = vst [vmem:[%s1478_s28 + $0x50] sm:$0xff] (%p2008_p4), %v1503_v17 }
  0xd2   : > { %1706 = vmatpush.msk.msrb.mxu2 %vm683_vm0, %v999_v28  ;;  %1708 = vmatpush.msk.msrb.mxu3 %vm683_vm0, %v1000_v30  ;;  %1506 = vst [vmem:[%s1478_s28 + $0x58] sm:$0xff] (%p2008_p4), %v1505_v18 }
  0xd3   : > { %1707 = vmatmul.msk.f32.vlgmr.msrb.gmra.mxu2 %vm676_vm1, %v1001_v15  ;;  %1709 = vmatmul.msk.f32.vlgmr.msrb.gmra.mxu3 %vm676_vm1, %v1001_v15 }
 0x149   : > { %v1040_v34 = vpop.f32.mrf.mxu0  ;;  %v1060_v38 = vpop.f32.mrf.mxu1 }
 0x14a   : > { %v1041_v37 = vadd.f32 %v1040_v34, %v2115_v33  ;;  %v1061_v39 = vadd.f32 %v1060_v38, %v2115_v33 }
 0x14c   : > { %v1103_v40 = vmax.f32 %v1041_v37, 0.0  ;;  %v1104_v31 = vmax.f32 %v1061_v39, 0.0 }
 0x14e   : > { %1710 = vmatpush.msk.msra.mxu0 %vm1118_vm4, %v1103_v40  ;;  %1712 = vmatpush.msk.msra.mxu1 %vm1118_vm4, %v1104_v31 }
 0x14f   : > { %1711 = vmatmul.msk.f32.vlgmr.msra.gmra.mxu0 %vm1114_vm5, %v1107_v41  ;;  %1713 = vmatmul.msk.f32.vlgmr.msra.gmra.mxu1 %vm1114_vm5, %v1107_v41 }
 0x156   : > { %v1080_v42 = vpop.f32.mrf.mxu2  ;;  %v1100_v35 = vpop.f32.mrf.mxu3 }
 0x157   : > { %v1081_v43 = vadd.f32 %v1080_v42, %v2115_v33  ;;  %v1101_v46 = vadd.f32 %v1100_v35, %v2115_v33 }
 0x159   : > { %v1105_v47 = vmax.f32 %v1081_v43, 0.0  ;;  %v1106_v49 = vmax.f32 %v1101_v46, 0.0 }
 0x15b   : > { %1714 = vmatpush.msk.msra.mxu2 %vm1118_vm4, %v1105_v47  ;;  %1716 = vmatpush.msk.msra.mxu3 %vm1118_vm4, %v1106_v49 }
 0x15c   : > { %1715 = vmatmul.msk.f32.vlgmr.msra.gmra.mxu2 %vm1114_vm5, %v1107_v41  ;;  %1717 = vmatmul.msk.f32.vlgmr.msra.gmra.mxu3 %vm1114_vm5, %v1107_v41 }
 0x1cc   : > { %v1148_v51 = vpop.f32.mrf.mxu0  ;;  %v1168_v52 = vpop.f32.mrf.mxu1 }
 0x1cd   : > { %v1149_v50 = vadd.f32 %v1148_v51, %v2113_v32  ;;  %v1169_v53 = vadd.f32 %v1168_v52, %v2113_v32 }
 0x1cf   : > { %v1211_v45 = vmax.f32 %v1149_v50, 0.0  ;;  %v1212_v55 = vmax.f32 %v1169_v53, 0.0 }
 0x1d1   : > { %1718 = vmatpush.msk.msrb.mxu0 %vm683_vm0, %v1211_v45  ;;  %1720 = vmatpush.msk.msrb.mxu1 %vm683_vm0, %v1212_v55 }
 0x1d2   : > { %1719 = vmatmul.msk.f32.vlgmr.msrb.gmra.mxu0 %vm676_vm1, %v1215_v54  ;;  %1721 = vmatmul.msk.f32.vlgmr.msrb.gmra.mxu1 %vm676_vm1, %v1215_v54 }
 0x1df   : > { %v1188_v33 = vpop.f32.mrf.mxu2  ;;  %v1208_v59 = vpop.f32.mrf.mxu3 }
 0x1e0   : > { %v1189_v56 = vadd.f32 %v1188_v33, %v2113_v32  ;;  %v1209_v60 = vadd.f32 %v1208_v59, %v2113_v32 }
 0x1e2   : > { %v1213_v61 = vmax.f32 %v1189_v56, 0.0  ;;  %v1214_v63 = vmax.f32 %v1209_v60, 0.0 }
 0x1e4   : > { %1722 = vmatpush.msk.msrb.mxu2 %vm683_vm0, %v1213_v61  ;;  %1724 = vmatpush.msk.msrb.mxu3 %vm683_vm0, %v1214_v63 }
 0x1e5   : > { %1723 = vmatmul.msk.f32.vlgmr.msrb.gmra.mxu2 %vm676_vm1, %v1215_v54  ;;  %1725 = vmatmul.msk.f32.vlgmr.msrb.gmra.mxu3 %vm676_vm1, %v1215_v54 }
 0x24f   : > { %v1254_v1 = vpop.f32.mrf.mxu0  ;;  %v1274_v3 = vpop.f32.mrf.mxu1 }
 0x250   : > { %v1255_v2 = vadd.f32 %v1254_v1, %v2119_v36  ;;  %v1275_v5 = vadd.f32 %v1274_v3, %v2119_v36 }
 0x252   : > { %v1440_v6 = vrot.slane %v1255_v2, 4  ;;  %v1441_v32 = vrot.slane %v1275_v5, 4 }
 0x254   : > { %v1448_v4 = vsel %vm683_vm0, %v2156_v24, %v1440_v6  ;;  %v1449_v9 = vsel %vm683_vm0, %v2160_v29, %v1441_v32 }
 0x255   : > { %v1453_v8 = vsel %vm1452_vm6, %v1448_v4, %v1396_v7  ;;  %v1454_v13 = vsel %vm1452_vm6, %v1449_v9, %v1397_v10  ;;  %v1501_v10 = vld [vmem:[%s2135_s20 + $0x28] sm:$0xff] (%p2008_p4) }
 0x256   : > { %1461 = vst [vmem:[%s2150_s2 + $0x20] sm:$0x7f] %v1453_v8 }
 0x257   : > { %1462 = vst [vmem:[%s2150_s2 + $0x28] sm:$0x7f] %v1454_v13 }
 0x258   : > { %1502 = vst [vmem:[%s1478_s28 + $0x48] sm:$0xff] (%p2008_p4), %v1501_v10 }
 0x268   : > { %v1294_v14 = vpop.f32.mrf.mxu2  ;;  %v1314_v24 = vpop.f32.mrf.mxu3 }
 0x269   : > { %v1295_v15 = vadd.f32 %v1294_v14, %v2119_v36  ;;  %v1315_v16 = vadd.f32 %v1314_v24, %v2119_v36  ;;  %v1491_v36 = vld [vmem:[%s2135_s20] sm:$0xff] (%p2008_p4) }
 0x26a   : > { %1492 = vst [vmem:[%s1478_s28] sm:$0xff] (%p2008_p4), %v1491_v36 }
 0x26b   : > { %v1442_v11 = vrot.slane %v1295_v15, 4  ;;  %v1443_v58 = vrot.slane %v1315_v16, 4 }
 0x26c   : > { %1475 = sbr.rel (!%p2008_p4) target bundleno = 626 (0x272), region = 104 }
 0x26d   : > { %v1450_v7 = vsel %vm683_vm0, %v2179_v57, %v1442_v11  ;;  %v1451_v12 = vsel %vm683_vm0, %v2185_v62, %v1443_v58  ;;  %v1497_v57 = vld [vmem:[%s2135_s20 + $0x18] sm:$0xff] (%p2008_p4)  ;;  %v1499_v62 = vld [vmem:[%s2135_s20 + $0x20] sm:$0xff] (%p2008_p4) }
 0x26e   : > { %v1455_v29 = vsel %vm1452_vm6, %v1450_v7, %v1398_v22  ;;  %v1456_v0 = vsel %vm1452_vm6, %v1451_v12, %v1399_v26  ;;  %1498 = vst [vmem:[%s1478_s28 + $0x18] sm:$0xff] (%p2008_p4), %v1497_v57 }
 0x26f   : > { %1463 = vst [vmem:[%s2150_s2 + $0x30] sm:$0x7f] %v1455_v29 }
 0x270   : > { %1464 = vst [vmem:[%s2150_s2 + $0x38] sm:$0x7f] %v1456_v0 }
 0x271   : > { %1500 = vst [vmem:[%s1478_s28 + $0x40] sm:$0xff] %v1499_v62 }
 0x272 PF: > { %1512 = sbr.rel (!%p2008_p4) target bundleno = 636 (0x27c), region = 127  ;;  %s1735_s14 = sshll.u32 (%p2008_p4), %s1996_s9, 5  ;;  %v1528_v19 = vld [vmem:[%s2150_s2] sm:$0xff] (%p2008_p4)  ;;  %v1530_v20 = vld [vmem:[%s2150_s2 + $0x8] sm:$0xff] (%p2008_p4)  ;;  %v1532_v21 = vld [vmem:[%s2150_s2 + $0x10] sm:$0xff] (%p2008_p4) }
 0x273   : > { %s1515_s22 = scalar_lea.vmem (%p2008_p4), %s2330_s19, %s1735_s14  ;;  %v1534_v22 = vld [vmem:[%s2150_s2 + $0x18] sm:$0xff] (%p2008_p4)  ;;  %v1536_v23 = vld [vmem:[%s2150_s2 + $0x20] sm:$0xff] (%p2008_p4)  ;;  %v1538_v25 = vld [vmem:[%s2150_s2 + $0x28] sm:$0xff] (%p2008_p4) }
 0x274   : > { %1529 = vst [vmem:[%s1515_s22] sm:$0xff] (%p2008_p4), %v1528_v19 }
 0x275   : > { %1531 = vst [vmem:[%s1515_s22 + $0x8] sm:$0xff] (%p2008_p4), %v1530_v20 }
 0x276   : > { %1533 = vst [vmem:[%s1515_s22 + $0x10] sm:$0xff] (%p2008_p4), %v1532_v21 }
 0x277   : > { %1535 = vst [vmem:[%s1515_s22 + $0x18] sm:$0xff] %v1534_v22  ;;  %v1540_v26 = vld [vmem:[%s2150_s2 + $0x30] sm:$0xff] }
 0x278   : > { %1537 = vst [vmem:[%s1515_s22 + $0x40] sm:$0xff] %v1536_v23  ;;  %v1542_v27 = vld [vmem:[%s2150_s2 + $0x38] sm:$0xff] }
 0x279   : > { %1539 = vst [vmem:[%s1515_s22 + $0x48] sm:$0xff] %v1538_v25 }
 0x27a   : > { %1541 = vst [vmem:[%s1515_s22 + $0x50] sm:$0xff] %v1540_v26 }
 0x27b   : > { %1543 = vst [vmem:[%s1515_s22 + $0x58] sm:$0xff] %v1542_v27 }
 0x27c PF: > { %s2352_s1 = sld [smem:[#allocation12_spill]] }
 0x27d   : > { %s2353_s20 = sld [smem:[#allocation11_spill]] }
 0x27e   : > { %s2354_s21 = sld [smem:[#allocation13_spill]] }
 0x282   : > { %p31_p11 = scmp.ge.s32.totalorder %s2352_s1, 4  }
 0x284   :  { %33 = sbr.rel (!%p31_p11) target bundleno = 10 (0xa), region = 193 }
 0x289   :  { %1566 = vsyncpa [#allocation4], 1 }
 0x28a   :  { %1568 = vsyncpa [#allocation4 + $0x1], 1 }
 0x28b   :  { %1569 = vsyncpa [#allocation6], 1 }

// kernel: edgeconv_forward.3
= control target key start
LH: loop header
LB: loop body
LE: loop exit
PB: predicated region body
PF: predicated region fallthrough
CT: control target
= control target key end

     0   :  { %s2257_s21 = smov 0   ;;  %s2259_s22 = smov 0   ;;  %s2828_s0 = inlined_call_operand.vmem [shape: f32[13,1024], index: 0, kind: input, shape index: {}]   ;;  %s2829_s1 = inlined_call_operand.vmem [shape: f32[75,1024], index: 1, kind: input, shape index: {}]   ;;  %s2830_s2 = inlined_call_operand.vmem [shape: f32[20,4], index: 2, kind: input, shape index: {}]   ;;  %s2831_s3 = inlined_call_operand.vmem [shape: f32[2,10], index: 3, kind: input, shape index: {}]   ;;  %s2832_s4 = inlined_call_operand.vmem [shape: f32[25,20], index: 4, kind: input, shape index: {}]   ;;  %s2833_s5 = inlined_call_operand.vmem [shape: f32[25,1], index: 5, kind: input, shape index: {}]   ;;  %s2834_s6 = inlined_call_operand.vmem [shape: f32[20,25], index: 6, kind: input, shape index: {}]   ;;  %s2835_s7 = inlined_call_operand.vmem [shape: f32[20,1], index: 7, kind: input, shape index: {}]   ;;  %s2836_s8 = inlined_call_operand.vmem [shape: f32[10,20], index: 8, kind: input, shape index: {}]   ;;  %s2837_s9 = inlined_call_operand.vmem [shape: f32[10,1], index: 9, kind: input, shape index: {}]   ;;  %s2838_s10 = inlined_call_operand.vmem [shape: f32[8,1024], index: 10, kind: output, shape index: {0}]   ;;  %s2839_s11 = inlined_call_operand.vmem [shape: f32[2,1024], index: 11, kind: output, shape index: {1}]   ;;  %s2840_s12 = inlined_call_operand.vmem [shape: f32[1,1024], index: 12, kind: output, shape index: {2}]  }
   0x1   :  { %s2261_s23 = smov 0  }
   0x2 LB: > { %s2025_s24 = sadd.s32 4294967295, %s2189_s23   ;;  %s2274_s25 = sadd.s32 1, %s2189_s23   ;;  %s2189_s23 = sphi %s2261_s23, %s2844_s23   ;;  %s2185_s22 = sphi %s2259_s22, %s2843_s22   ;;  %s2181_s21 = sphi %s2257_s21, %s2842_s21  }
   0x3   : > { %s27_s26 = ssub.s32 %s2189_s23, %s2274_s25  ;;  %s30_s27 = sadd.s32 1, %s2185_s22 }
   0x4   : > { %p28_p0 = scmp.eq.s32.totalorder %s27_s26, 0  ;;  %p37_p1 = scmp.ne.s32.totalorder %s2185_s22, %s2181_s21 }
   0x5   : > { %p38_p2 = scmp.eq.s32.totalorder %s2189_s23, 0  ;;  %p2028_p4 = scmp.ge.s32.totalorder %s2189_s23, 2 }
   0x6   : > { %s2283_s28 = scalar_select %p28_p0, %s2185_s22, %s30_s27  }
   0x7   : > { %p2285_p3 = por %p38_p2, %p37_p1  ;;  %359 = sbr.rel (%p2028_p4) target bundleno = 68 (0x44), region = 48 }
   0xc   : > { %362 = sbr.rel (!%p2285_p3) target bundleno = 24 (0x18), region = 52  ;;  %s364_s30 = sand.u32 (%p2285_p3), 1, %s2185_s22  }
   0xd   : > { %s2119_s13 = sshll.u32 (%p2285_p3), %s2189_s23, 5  ;;  %s2029_s14 = sshll.u32 (%p2285_p3), %s364_s30, 6 }
   0xe   : > { %s369_s17 = scalar_lea.vmem (%p2285_p3), %s2828_s0, %s2119_s13  ;;  %s366_s18 = scalar_lea.vmem (%p2285_p3), [#allocation2], %s2029_s14 }
   0xf   : > { %v382_v0 = vld [vmem:[%s369_s17] sm:$0xff] (%p2285_p3)  ;;  %v384_v1 = vld [vmem:[%s369_s17 + $0x8] sm:$0xff] (%p2285_p3)  ;;  %v386_v2 = vld [vmem:[%s369_s17 + $0x10] sm:$0xff] (%p2285_p3) }
  0x10   : > { %383 = vst [vmem:[%s366_s18] sm:$0xff] (%p2285_p3), %v382_v0  ;;  %v388_v3 = vld [vmem:[%s369_s17 + $0x18] sm:$0xff] (%p2285_p3)  ;;  %v390_v4 = vld [vmem:[%s369_s17 + $0x40] sm:$0xff] (%p2285_p3)  ;;  %v392_v5 = vld [vmem:[%s369_s17 + $0x48] sm:$0xff] (%p2285_p3) }
  0x11   : > { %385 = vst [vmem:[%s366_s18 + $0x8] sm:$0xff] %v384_v1  ;;  %v394_v6 = vld [vmem:[%s369_s17 + $0x50] sm:$0xff]  ;;  %v396_v7 = vld [vmem:[%s369_s17 + $0x58] sm:$0xff] }
  0x12   : > { %387 = vst [vmem:[%s366_s18 + $0x10] sm:$0xff] %v386_v2 }
  0x13   : > { %389 = vst [vmem:[%s366_s18 + $0x18] sm:$0xff] %v388_v3 }
  0x14   : > { %391 = vst [vmem:[%s366_s18 + $0x20] sm:$0xff] %v390_v4 }
  0x15   : > { %393 = vst [vmem:[%s366_s18 + $0x28] sm:$0xff] %v392_v5 }
  0x16   : > { %395 = vst [vmem:[%s366_s18 + $0x30] sm:$0xff] %v394_v6 }
  0x17   : > { %397 = vst [vmem:[%s366_s18 + $0x38] sm:$0xff] %v396_v7 }
  0x18 PF: > { %403 = sbr.rel (!%p2285_p3) target bundleno = 68 (0x44), region = 75  ;;  %s405_s19 = sand.u32 (%p2285_p3), 1, %s2185_s22  }
  0x19   : > { %s2120_s20 = sshll.u32 (%p2285_p3), %s2189_s23, 5  ;;  %s2121_s26 = smul.u32 (%p2285_p3), 320, %s405_s19 }
  0x1a   : > { %s2304_s13 = scalar_lea.vmem (%p2285_p3), %s2829_s1, %s2120_s20 }
  0x1b   : > { %v423_v8 = vld [vmem:[%s2304_s13] sm:$0xff] (%p2285_p3)  ;;  %v425_v9 = vld [vmem:[%s2304_s13 + $0x8] sm:$0xff] (%p2285_p3)  ;;  %v427_v10 = vld [vmem:[%s2304_s13 + $0x10] sm:$0xff] (%p2285_p3)  ;;  %s2309_s29 = scalar_lea.vmem (%p2285_p3), [#allocation3], %s2121_s26 }
  0x1c   : > { %424 = vst [vmem:[%s2309_s29] sm:$0xff] (%p2285_p3), %v423_v8  ;;  %v429_v11 = vld [vmem:[%s2304_s13 + $0x18] sm:$0xff] (%p2285_p3)  ;;  %v431_v12 = vld [vmem:[%s2304_s13 + $0x40] sm:$0xff] (%p2285_p3)  ;;  %v433_v13 = vld [vmem:[%s2304_s13 + $0x48] sm:$0xff] (%p2285_p3) }
  0x1d   : > { %426 = vst [vmem:[%s2309_s29 + $0x8] sm:$0xff] %v425_v9  ;;  %v435_v14 = vld [vmem:[%s2304_s13 + $0x50] sm:$0xff]  ;;  %v437_v15 = vld [vmem:[%s2304_s13 + $0x58] sm:$0xff]  ;;  %v439_v16 = vld [vmem:[%s2304_s13 + $0x80] sm:$0xff] }
  0x1e   : > { %428 = vst [vmem:[%s2309_s29 + $0x10] sm:$0xff] %v427_v10  ;;  %v441_v17 = vld [vmem:[%s2304_s13 + $0x88] sm:$0xff]  ;;  %v443_v18 = vld [vmem:[%s2304_s13 + $0x90] sm:$0xff]  ;;  %v445_v19 = vld [vmem:[%s2304_s13 + $0x98] sm:$0xff] }
  0x1f   : > { %430 = vst [vmem:[%s2309_s29 + $0x18] sm:$0xff] %v429_v11  ;;  %v447_v20 = vld [vmem:[%s2304_s13 + $0xc0] sm:$0xff]  ;;  %v449_v21 = vld [vmem:[%s2304_s13 + $0xc8] sm:$0xff]  ;;  %v451_v22 = vld [vmem:[%s2304_s13 + $0xd0] sm:$0xff] }
  0x20   : > { %432 = vst [vmem:[%s2309_s29 + $0x20] sm:$0xff] %v431_v12  ;;  %v453_v23 = vld [vmem:[%s2304_s13 + $0xd8] sm:$0xff]  ;;  %v455_v24 = vld [vmem:[%s2304_s13 + $0x100] sm:$0xff]  ;;  %v457_v25 = vld [vmem:[%s2304_s13 + $0x108] sm:$0xff] }
  0x21   : > { %434 = vst [vmem:[%s2309_s29 + $0x28] sm:$0xff] %v433_v13  ;;  %v459_v26 = vld [vmem:[%s2304_s13 + $0x110] sm:$0xff]  ;;  %v461_v27 = vld [vmem:[%s2304_s13 + $0x118] sm:$0xff]  ;;  %v463_v28 = vld [vmem:[%s2304_s13 + $0x140] sm:$0xff] }
  0x22   : > { %436 = vst [vmem:[%s2309_s29 + $0x30] sm:$0xff] %v435_v14  ;;  %v465_v29 = vld [vmem:[%s2304_s13 + $0x148] sm:$0xff]  ;;  %v467_v30 = vld [vmem:[%s2304_s13 + $0x150] sm:$0xff]  ;;  %v469_v31 = vld [vmem:[%s2304_s13 + $0x158] sm:$0xff] }
  0x23   : > { %438 = vst [vmem:[%s2309_s29 + $0x38] sm:$0xff] %v437_v15  ;;  %v471_v32 = vld [vmem:[%s2304_s13 + $0x180] sm:$0xff]  ;;  %v473_v33 = vld [vmem:[%s2304_s13 + $0x188] sm:$0xff]  ;;  %v475_v34 = vld [vmem:[%s2304_s13 + $0x190] sm:$0xff] }
  0x24   : > { %440 = vst [vmem:[%s2309_s29 + $0x40] sm:$0xff] %v439_v16  ;;  %v477_v35 = vld [vmem:[%s2304_s13 + $0x198] sm:$0xff]  ;;  %v479_v36 = vld [vmem:[%s2304_s13 + $0x1c0] sm:$0xff]  ;;  %v481_v37 = vld [vmem:[%s2304_s13 + $0x1c8] sm:$0xff] }
  0x25   : > { %442 = vst [vmem:[%s2309_s29 + $0x48] sm:$0xff] %v441_v17  ;;  %v483_v38 = vld [vmem:[%s2304_s13 + $0x1d0] sm:$0xff]  ;;  %v485_v39 = vld [vmem:[%s2304_s13 + $0x1d8] sm:$0xff]  ;;  %v487_v40 = vld [vmem:[%s2304_s13 + $0x200] sm:$0xff] }
  0x26   : > { %444 = vst [vmem:[%s2309_s29 + $0x50] sm:$0xff] %v443_v18  ;;  %v489_v41 = vld [vmem:[%s2304_s13 + $0x208] sm:$0xff]  ;;  %v491_v42 = vld [vmem:[%s2304_s13 + $0x210] sm:$0xff]  ;;  %v493_v43 = vld [vmem:[%s2304_s13 + $0x218] sm:$0xff] }
  0x27   : > { %446 = vst [vmem:[%s2309_s29 + $0x58] sm:$0xff] %v445_v19  ;;  %v495_v44 = vld [vmem:[%s2304_s13 + $0x240] sm:$0xff]  ;;  %v497_v45 = vld [vmem:[%s2304_s13 + $0x248] sm:$0xff]  ;;  %v499_v46 = vld [vmem:[%s2304_s13 + $0x250] sm:$0xff] }
  0x28   : > { %448 = vst [vmem:[%s2309_s29 + $0x60] sm:$0xff] %v447_v20  ;;  %v501_v47 = vld [vmem:[%s2304_s13 + $0x258] sm:$0xff] }
  0x29   : > { %450 = vst [vmem:[%s2309_s29 + $0x68] sm:$0xff] %v449_v21 }
  0x2a   : > { %452 = vst [vmem:[%s2309_s29 + $0x70] sm:$0xff] %v451_v22 }
  0x2b   : > { %454 = vst [vmem:[%s2309_s29 + $0x78] sm:$0xff] %v453_v23 }
  0x2c   : > { %456 = vst [vmem:[%s2309_s29 + $0x80] sm:$0xff] %v455_v24 }
  0x2d   : > { %458 = vst [vmem:[%s2309_s29 + $0x88] sm:$0xff] %v457_v25 }
  0x2e   : > { %460 = vst [vmem:[%s2309_s29 + $0x90] sm:$0xff] %v459_v26 }
  0x2f   : > { %462 = vst [vmem:[%s2309_s29 + $0x98] sm:$0xff] %v461_v27 }
  0x30   : > { %464 = vst [vmem:[%s2309_s29 + $0xa0] sm:$0xff] %v463_v28 }
  0x31   : > { %466 = vst [vmem:[%s2309_s29 + $0xa8] sm:$0xff] %v465_v29 }
  0x32   : > { %468 = vst [vmem:[%s2309_s29 + $0xb0] sm:$0xff] %v467_v30 }
  0x33   : > { %470 = vst [vmem:[%s2309_s29 + $0xb8] sm:$0xff] %v469_v31 }
  0x34   : > { %472 = vst [vmem:[%s2309_s29 + $0xc0] sm:$0xff] %v471_v32 }
  0x35   : > { %474 = vst [vmem:[%s2309_s29 + $0xc8] sm:$0xff] %v473_v33 }
  0x36   : > { %476 = vst [vmem:[%s2309_s29 + $0xd0] sm:$0xff] %v475_v34 }
  0x37   : > { %478 = vst [vmem:[%s2309_s29 + $0xd8] sm:$0xff] %v477_v35 }
  0x38   : > { %480 = vst [vmem:[%s2309_s29 + $0xe0] sm:$0xff] %v479_v36 }
  0x39   : > { %482 = vst [vmem:[%s2309_s29 + $0xe8] sm:$0xff] %v481_v37 }
  0x3a   : > { %484 = vst [vmem:[%s2309_s29 + $0xf0] sm:$0xff] %v483_v38 }
  0x3b   : > { %486 = vst [vmem:[%s2309_s29 + $0xf8] sm:$0xff] %v485_v39 }
  0x3c   : > { %488 = vst [vmem:[%s2309_s29 + $0x100] sm:$0xff] %v487_v40 }
  0x3d   : > { %490 = vst [vmem:[%s2309_s29 + $0x108] sm:$0xff] %v489_v41 }
  0x3e   : > { %492 = vst [vmem:[%s2309_s29 + $0x110] sm:$0xff] %v491_v42 }
  0x3f   : > { %494 = vst [vmem:[%s2309_s29 + $0x118] sm:$0xff] %v493_v43 }
  0x40   : > { %496 = vst [vmem:[%s2309_s29 + $0x120] sm:$0xff] %v495_v44 }
  0x41   : > { %498 = vst [vmem:[%s2309_s29 + $0x128] sm:$0xff] %v497_v45 }
  0x42   : > { %500 = vst [vmem:[%s2309_s29 + $0x130] sm:$0xff] %v499_v46 }
  0x43   : > { %502 = vst [vmem:[%s2309_s29 + $0x138] sm:$0xff] %v501_v47 }
  0x44 PF: > { %p2034_p5 = scmp.ge.s32.totalorder %s2189_s23, 1  ;;  %p507_p6 = scmp.lt.s32.totalorder %s2189_s23, 3 }
  0x46   : > { %p508_p7 = pnand %p2034_p5, %p507_p6 }
  0x47   : > { %s514_s14 = sand.u32 (!%p508_p7), 1, %s2181_s21  }
  0x48   : > { %511 = sbr.rel (%p508_p7) target bundleno = 847 (0x34f), region = 98  ;;  %s2035_s15 = sshll.u32 (!%p508_p7), %s514_s14, 6 }
  0x49   : > { %s2122_s16 = smul.u32 (!%p508_p7), 320, %s514_s14  ;;  %s2394_s19 = scalar_lea.vmem (!%p508_p7), [#allocation2], %s2035_s15 }
  0x4b   : > { %s2398_s20 = scalar_lea.vmem (!%p508_p7), [#allocation3], %s2122_s16 }
  0x4d   : > { %vm724_vm0 = vcmask 1043456   ;;  %vm847_vm1 = vcmask 1047558   ;;  %vm849_vm2 = vcmask 1042432   ;;  %v1108_v48 = vld [vmem:[%s2830_s2] sm:$0xff]  ;;  %vm1111_vm3 = vcmask 31744   ;;  %v1109_v60 = vld [vmem:[%s2830_s2 + $0x8] sm:$0xff] }
  0x4e   : > { %v598_v49 = vld [vmem:[%s2394_s19 + $0x20] sm:$0x1f]  ;;  %v599_v50 = vld [vmem:[%s2394_s19 + $0x28] sm:$0x1f]  ;;  %v956_v51 = vld [vmem:[%s2398_s20 + $0x100] sm:$0xc0] }
  0x4f   : > { %v960_v52 = vld [vmem:[%s2398_s20 + $0x120] sm:$0x7]  ;;  %2045 = vmatpush.msk.msra.mxu0 %vm724_vm0, %v598_v49  ;;  %2049 = vmatpush.msk.msra.mxu1 %vm724_vm0, %v599_v50  ;;  %v2405_v53 = vld [vmem:[%s2394_s19 + $0x30] sm:$0x1f]  ;;  %v964_v54 = vsel %vm847_vm1, %v956_v51, -inf }
  0x50   : > { %v965_v55 = vsel %vm849_vm2, %v960_v52, -inf  ;;  %2053 = vmatpush.msk.msra.mxu2 %vm724_vm0, %v2405_v53  ;;  %v2412_v56 = vld [vmem:[%s2394_s19 + $0x38] sm:$0x1f]  ;;  %2046 = vmatmul.msk.f32.vlgmr.msra.gmra.mxu0 %vm1111_vm3, %v1108_v48  ;;  %v957_v1 = vld [vmem:[%s2398_s20 + $0x108] sm:$0xc0] }
  0x51   : > { %v966_v57 = vmax.f32 %v964_v54, %v965_v55  ;;  %2057 = vmatpush.msk.msra.mxu3 %vm724_vm0, %v2412_v56  ;;  %2050 = vmatmul.msk.f32.vlgmr.msra.gmra.mxu1 %vm1111_vm3, %v1108_v48  ;;  %v961_v2 = vld [vmem:[%s2398_s20 + $0x128] sm:$0x7]  ;;  %v973_v4 = vsel %vm847_vm1, %v957_v1, -inf  ;;  %v958_v17 = vld [vmem:[%s2398_s20 + $0x110] sm:$0xc0] }
  0x52   : > { %2054 = vmatmul.msk.f32.vlgmr.msra.gmra.mxu2 %vm1111_vm3, %v1108_v48  ;;  %2058 = vmatmul.msk.f32.vlgmr.msra.gmra.mxu3 %vm1111_vm3, %v1108_v48  ;;  %v1110_v3 = vld [vmem:[%s2830_s2 + $0x10] sm:$0xf]  ;;  %v974_v5 = vsel %vm849_vm2, %v961_v2, -inf  ;;  %v962_v18 = vld [vmem:[%s2398_s20 + $0x130] sm:$0x7]  ;;  %v982_v20 = vsel %vm847_vm1, %v958_v17, -inf }
  0x53   : > { %v967_v58 = vrot.slane %v966_v57, 4  ;;  %v975_v7 = vmax.f32 %v973_v4, %v974_v5  ;;  %v983_v21 = vsel %vm849_vm2, %v962_v18, -inf  ;;  %v959_v41 = vld [vmem:[%s2398_s20 + $0x118] sm:$0xc0]  ;;  %v963_v42 = vld [vmem:[%s2398_s20 + $0x138] sm:$0x7] }
  0x54   : > { %v984_v22 = vmax.f32 %v982_v20, %v983_v21  ;;  %v991_v44 = vsel %vm847_vm1, %v959_v41, -inf  ;;  %v992_v46 = vsel %vm849_vm2, %v963_v42, -inf }
  0x55   : > { %v968_v59 = vmax.f32 %v966_v57, %v967_v58  ;;  %v976_v9 = vrot.slane %v975_v7, 4  ;;  %v993_v47 = vmax.f32 %v991_v44, %v992_v46 }
  0x56   : > { %v985_v24 = vrot.slane %v984_v22, 4 }
  0x57   : > { %v969_v61 = vrot.slane %v968_v59, 2  ;;  %v977_v10 = vmax.f32 %v975_v7, %v976_v9 }
  0x58   : > { %2047 = vmatmul.msk.f32.gmra.mxu0 %vm1111_vm3, %v1109_v60  ;;  %v986_v26 = vmax.f32 %v984_v22, %v985_v24 }
  0x59   : > { %v970_v62 = vmax.f32 %v968_v59, %v969_v61  ;;  %2051 = vmatmul.msk.f32.gmra.mxu1 %vm1111_vm3, %v1109_v60  ;;  %v978_v11 = vrot.slane %v977_v10, 2 }
  0x5a   : > { %2055 = vmatmul.msk.f32.gmra.mxu2 %vm1111_vm3, %v1109_v60  ;;  %2059 = vmatmul.msk.f32.gmra.mxu3 %vm1111_vm3, %v1109_v60  ;;  %v987_v29 = vrot.slane %v986_v26, 2 }
  0x5b   : > { %v971_v63 = vrot.slane %v970_v62, 1  ;;  %v979_v12 = vmax.f32 %v977_v10, %v978_v11 }
  0x5c   : > { %v988_v32 = vmax.f32 %v986_v26, %v987_v29  ;;  %v2191_v29 = vmov 0  }
  0x5d   : > { %v972_v0 = vmax.f32 %v970_v62, %v971_v63  ;;  %v980_v14 = vrot.slane %v979_v12, 1  ;;  %2149 = vset.pattern.permute.xlu1 %v2191_v29  ;;  %2148 = vset.pattern.permute.xlu0 %v2191_v29 }
  0x5e   : > { %v989_v37 = vrot.slane %v988_v32, 1  ;;  %2150 = vset.pattern.permute.xlu2 %v2191_v29 }
  0x5f   : > { %v1000_v6 = vadd.f32 %v972_v0, %v598_v49  ;;  %v981_v16 = vmax.f32 %v979_v12, %v980_v14 }
  0x60   : > { %2048 = vmatmul.msk.f32.gmra.mxu0 %vm1111_vm3, %v1110_v3  ;;  %v990_v40 = vmax.f32 %v988_v32, %v989_v37  ;;  %v1096_v37 = vld [vmem:[%s2398_s20 + $0xa0] sm:$0xff] }
  0x61   : > { %v2041_v8 = vmul.f32 -1.442695, %v1000_v6  ;;  %2052 = vmatmul.msk.f32.gmra.mxu1 %vm1111_vm3, %v1110_v3  ;;  %v1001_v19 = vadd.f32 %v981_v16, %v599_v50  ;;  %v994_v50 = vrot.slane %v993_v47, 4 }
  0x62   : > { %2056 = vmatmul.msk.f32.gmra.mxu2 %vm1111_vm3, %v1110_v3  ;;  %2060 = vmatmul.msk.f32.gmra.mxu3 %vm1111_vm3, %v1110_v3  ;;  %v1002_v45 = vadd.f32 %v990_v40, %v2405_v53  ;;  %v1105_v40 = vld [vmem:[%s2398_s20 + $0xe8] sm:$0xf] }
  0x63   : > { %2151 = vpow2.f32 %v2041_v8  ;;  %v2042_v23 = vmul.f32 -1.442695, %v1001_v19  ;;  %v995_v54 = vmax.f32 %v993_v47, %v994_v50 }
  0x64   : > { %v2043_v48 = vmul.f32 -1.442695, %v1002_v45 }
  0x65   : > { %v996_v58 = vrot.slane %v995_v54, 2 }
  0x67   : > { %v997_v61 = vmax.f32 %v995_v54, %v996_v58 }
  0x69   : > { %v2152_v13 = vpop.eup %2151  ;;  %v998_v0 = vrot.slane %v997_v61, 1 }
  0x6a   : > { %v1016_v15 = vadd.f32 1.0, %v2152_v13 }
  0x6b   : > { %v999_v3 = vmax.f32 %v997_v61, %v998_v0  ;;  %v1098_v0 = vld [vmem:[%s2398_s20 + $0xb0] sm:$0xff] }
  0x6c   : > { %2153 = vrcp.f32 %v1016_v15  ;;  %v1031_v28 = vand.u32 2147483648, %v1016_v15  ;;  %vm1025_vm4 = vweird.f32 %v1016_v15  ;;  %v1029_v31 = vand.u32 2147483647, %v1016_v15 }
  0x6d   : > { %2155 = vpow2.f32 %v2042_v23  ;;  %v1003_v4 = vadd.f32 %v999_v3, %v2412_v56 }
  0x6e   : > { %v1032_v35 = vor.u32 1.1754944e-38, %v1031_v28  ;;  %vm1030_vm7 = vcmp.eq.f32.partialorder %v1029_v31, 8.507059e+37 }
  0x6f   : > { %v2044_v5 = vmul.f32 -1.442695, %v1003_v4  ;;  %v1261_v4 = vld [vmem:[%s2832_s4] sm:$0xff] }
  0x72   : > { %v2154_v25 = vpop.eup %2153 }
  0x73   : > { %v1021_v27 = vmul.f32 %v2154_v25, %v1016_v15  ;;  %vm1026_vm5 = vweird.f32 %v2154_v25  ;;  %v2156_v33 = vpop.eup %2155 }
  0x74   : > { %vm1027_vm6 = vmor %vm1025_vm4, %vm1026_vm5  ;;  %v1017_v36 = vadd.f32 1.0, %v2156_v33 }
  0x75   : > { %v1022_v30 = vsub.f32 1.0, %v1021_v27 }
  0x76   : > { %2157 = vrcp.f32 %v1017_v36  ;;  %v1046_v52 = vand.u32 2147483648, %v1017_v36  ;;  %vm1040_vm8 = vweird.f32 %v1017_v36  ;;  %v1044_v57 = vand.u32 2147483647, %v1017_v36 }
  0x77   : > { %v1023_v34 = vmul.f32 %v2154_v25, %v1022_v30  ;;  %2159 = vpow2.f32 %v2043_v48 }
  0x78   : > { %v1047_v60 = vor.u32 1.1754944e-38, %v1046_v52  ;;  %vm1045_vm11 = vcmp.eq.f32.partialorder %v1044_v57, 8.507059e+37  ;;  %v1268_v52 = vld [vmem:[%s2833_s5 + $0x18] sm:$0x1] }
  0x79   : > { %v1024_v38 = vadd.f32 %v2154_v25, %v1023_v34  ;;  %v1266_v34 = vld [vmem:[%s2833_s5 + $0x8] sm:$0xff]  ;;  %1286 = vperm.xlu0 %2148, %v1268_v52  }
  0x7a   : > { %1276 = vperm.xlu1 %2149, %v1266_v34  }
  0x7b   : > { %v1028_v39 = vsel %vm1027_vm6, %v2154_v25, %v1024_v38  ;;  %v1097_v38 = vld [vmem:[%s2398_s20 + $0xa8] sm:$0xff] }
  0x7c   : > { %v1033_v43 = vsel %vm1030_vm7, %v1032_v35, %v1028_v39  ;;  %v2158_v49 = vpop.eup %2157  ;;  %v1100_v35 = vld [vmem:[%s2398_s20 + $0xc0] sm:$0xff]  ;;  %vm1289_vm7 = vcmask 162816  }
  0x7d   : > { %1084 = vst [vmem:[#allocation1] sm:$0xff] %v1033_v43  ;;  %v1036_v51 = vmul.f32 %v2158_v49, %v1017_v36  ;;  %vm1041_vm9 = vweird.f32 %v2158_v49  ;;  %v2160_v53 = vpop.eup %2159  ;;  %v1101_v36 = vld [vmem:[%s2398_s20 + $0xc8] sm:$0xff]  ;;  %v1104_v39 = vld [vmem:[%s2398_s20 + $0xe0] sm:$0xf] }
  0x7e   : > { %vm1042_vm10 = vmor %vm1040_vm8, %vm1041_vm9  ;;  %v1018_v63 = vadd.f32 1.0, %v2160_v53  ;;  %vm770_vm8 = vcmask 1040384   ;;  %vm1467_vm9 = vcmask 203776  }
  0x7f   : > { %v1037_v55 = vsub.f32 1.0, %v1036_v51  ;;  %v1265_v51 = vld [vmem:[%s2833_s5] sm:$0xff] }
  0x80   : > { %2161 = vrcp.f32 %v1018_v63  ;;  %v1061_v8 = vand.u32 2147483648, %v1018_v63  ;;  %vm1055_vm12 = vweird.f32 %v1018_v63  ;;  %v1059_v10 = vand.u32 2147483647, %v1018_v63 }
  0x81   : > { %v1038_v59 = vmul.f32 %v2158_v49, %v1037_v55  ;;  %2163 = vpow2.f32 %v2044_v5 }
  0x82   : > { %v1062_v12 = vor.u32 1.1754944e-38, %v1061_v8  ;;  %vm1060_vm15 = vcmp.eq.f32.partialorder %v1059_v10, 8.507059e+37  ;;  %1271 = vperm.xlu1 %2149, %v1265_v51   ;;  %v1608_v10 = vld [vmem:[%s2837_s9 + $0x8] sm:$0x3] }
  0x83   : > { %v1039_v62 = vadd.f32 %v2158_v49, %v1038_v59  ;;  %v1102_v59 = vld [vmem:[%s2398_s20 + $0xd0] sm:$0xff] }
  0x85   : > { %v1043_v1 = vsel %vm1042_vm10, %v2158_v49, %v1039_v62  ;;  %v1106_v62 = vld [vmem:[%s2398_s20 + $0xf0] sm:$0xf]  ;;  %vm645_vm10 = vcmask 1041408  }
  0x86   : > { %v1048_v2 = vsel %vm1045_vm11, %v1047_v60, %v1043_v1  ;;  %v2162_v6 = vpop.eup %2161  ;;  %v1103_v60 = vld [vmem:[%s2398_s20 + $0xd8] sm:$0xff]  ;;  %vm1774_vm11 = vcmask 80896  }
  0x87   : > { %1085 = vst [vmem:[#allocation1 + $0x9] sm:$0xff] %v1048_v2  ;;  %v1051_v7 = vmul.f32 %v2162_v6, %v1018_v63  ;;  %vm1056_vm13 = vweird.f32 %v2162_v6  ;;  %v2164_v13 = vpop.eup %2163  ;;  %v1107_v63 = vld [vmem:[%s2398_s20 + $0xf8] sm:$0xf] }
  0x88   : > { %vm1057_vm14 = vmor %vm1055_vm12, %vm1056_vm13  ;;  %v1019_v15 = vadd.f32 1.0, %v2164_v13  ;;  %v1099_v1 = vld [vmem:[%s2398_s20 + $0xb8] sm:$0xff]  ;;  %vm643_vm12 = vcmask 1047557   ;;  %vm606_vm13 = vcmask 1044480  }
  0x89   : > { %v1052_v9 = vsub.f32 1.0, %v1051_v7 }
  0x8a   : > { %2165 = vrcp.f32 %v1019_v15  ;;  %v1076_v19 = vand.u32 2147483648, %v1019_v15  ;;  %vm1070_vm3 = vweird.f32 %v1019_v15  ;;  %v1074_v21 = vand.u32 2147483647, %v1019_v15  ;;  %1616 = vperm.xlu1 %2149, %v1608_v10   ;;  %v1447_v10 = vld [vmem:[%s2834_s6 + $0x8] sm:$0xff] }
  0x8b   : > { %v1053_v11 = vmul.f32 %v2162_v6, %v1052_v9  ;;  %v1267_v9 = vld [vmem:[%s2833_s5 + $0x10] sm:$0xff] }
  0x8c   : > { %v1077_v23 = vor.u32 1.1754944e-38, %v1076_v19  ;;  %vm1075_vm6 = vcmp.eq.f32.partialorder %v1074_v21, 8.507059e+37  ;;  %1281 = vperm.xlu0 %2148, %v1267_v9   ;;  %v1449_v19 = vld [vmem:[%s2835_s7] sm:$0xff]  ;;  %v1264_v21 = vld [vmem:[%s2832_s4 + $0x18] sm:$0x1] }
  0x8d   : > { %v1054_v14 = vadd.f32 %v2162_v6, %v1053_v11 }
  0x8f   : > { %v1058_v16 = vsel %vm1057_vm14, %v2162_v6, %v1054_v14  ;;  %vm685_vm14 = vcmask 1046530  }
  0x90   : > { %v1063_v17 = vsel %vm1060_vm15, %v1062_v12, %v1058_v16  ;;  %v2166_v56 = vpop.eup %2165  ;;  %vm722_vm15 = vcmask 1047559  }
  0x91   : > { %1086 = vst [vmem:[#allocation1 + $0x12] sm:$0xff] %v1063_v17  ;;  %v1066_v18 = vmul.f32 %v2166_v56, %v1019_v15  ;;  %vm1071_vm4 = vweird.f32 %v2166_v56 }
  0x92   : > { %vm1072_vm5 = vmor %vm1070_vm3, %vm1071_vm4  ;;  %vm768_vm3 = vcmask 1047556   ;;  %vm810_vm4 = vcmask 1045505  }
  0x93   : > { %v1067_v20 = vsub.f32 1.0, %v1066_v18  ;;  %v1262_v18 = vld [vmem:[%s2832_s4 + $0x8] sm:$0xff] }
  0x94   : > { %1454 = vperm.xlu0 %2148, %v1449_v19  }
  0x95   : > { %v1068_v22 = vmul.f32 %v2166_v56, %v1067_v20  ;;  %v1263_v20 = vld [vmem:[%s2832_s4 + $0x10] sm:$0xff] }
  0x97   : > { %v1069_v24 = vadd.f32 %v2166_v56, %v1068_v22 }
  0x99   : > { %v1073_v25 = vsel %vm1072_vm5, %v2166_v56, %v1069_v24  ;;  %vm889_vm5 = vcmask 1047555  }
  0x9a   : > { %v1078_v26 = vsel %vm1075_vm6, %v1077_v23, %v1073_v25  ;;  %vm943_vm6 = vcmask 1046528  }
  0x9b   : > { %1087 = vst [vmem:[#allocation1 + $0x1b] sm:$0xff] %v1078_v26 }
  0xcd   : > { %v1150_v27 = vpop.f32.mrf.mxu0 }
  0xce   : > { %v1176_v28 = vpop.f32.mrf.mxu1  ;;  %v1237_v47 = vsub.f32 %v1150_v27, %v1096_v37 }
  0xcf   : > { %v1238_v48 = vsub.f32 %v1176_v28, %v1097_v38 }
  0xd0   : > { %v1249_v61 = vmax.f32 %v1237_v47, 0.0 }
  0xd1   : > { %v1250_v53 = vmax.f32 %v1238_v48, 0.0 }
  0xd5   : > { %v2448_v30 = vpop.f32.mrf.mxu2  ;;  %v2450_v31 = vpop.f32.mrf.mxu3 }
  0xd6   : > { %v1153_v32 = vpop.f32.mrf.mxu0  ;;  %v1179_v33 = vpop.f32.mrf.mxu1  ;;  %v1239_v11 = vsub.f32 %v2448_v30, %v1098_v0  ;;  %v1240_v12 = vsub.f32 %v2450_v31, %v1099_v1 }
  0xd7   : > { %v1241_v41 = vsub.f32 %v1153_v32, %v1100_v35  ;;  %v1242_v42 = vsub.f32 %v1179_v33, %v1101_v36 }
  0xd8   : > { %v1251_v17 = vmax.f32 %v1239_v11, 0.0  ;;  %v1252_v56 = vmax.f32 %v1240_v12, 0.0 }
  0xd9   : > { %v1253_v54 = vmax.f32 %v1241_v41, 0.0  ;;  %v1254_v55 = vmax.f32 %v1242_v42, 0.0 }
  0xdd   : > { %v1205_v43 = vpop.f32.mrf.mxu2  ;;  %v1231_v44 = vpop.f32.mrf.mxu3 }
  0xde   : > { %v1156_v45 = vpop.f32.mrf.mxu0  ;;  %v1182_v46 = vpop.f32.mrf.mxu1  ;;  %v1243_v5 = vsub.f32 %v1205_v43, %v1102_v59  ;;  %v1244_v6 = vsub.f32 %v1231_v44, %v1103_v60  ;;  %v1451_v59 = vld [vmem:[%s2835_s7 + $0x10] sm:$0xf] }
  0xdf   : > { %v1245_v49 = vsub.f32 %v1156_v45, %v1104_v39  ;;  %v1246_v50 = vsub.f32 %v1182_v46, %v1105_v40  ;;  %1464 = vperm.xlu2 %2150, %v1451_v59  }
  0xe0   : > { %v1255_v15 = vmax.f32 %v1243_v5, 0.0  ;;  %v1256_v16 = vmax.f32 %v1244_v6, 0.0  ;;  %v1450_v5 = vld [vmem:[%s2835_s7 + $0x8] sm:$0xff] }
  0xe1   : > { %v1257_v57 = vmax.f32 %v1245_v49, 0.0  ;;  %v1258_v58 = vmax.f32 %v1246_v50, 0.0 }
  0xe3   : > { %2061 = vmatpush.msk.msrb.mxu0 %vm724_vm0, %v1257_v57  ;;  %2066 = vmatpush.msk.msrb.mxu1 %vm724_vm0, %v1258_v58  ;;  %v1446_v58 = vld [vmem:[%s2834_s6] sm:$0xff] }
  0xe5   : > { %v1208_v2 = vpop.f32.mrf.mxu2  ;;  %v1234_v3 = vpop.f32.mrf.mxu3  ;;  %1328 = vmatpush.msrb.mxu0 %v1253_v54  ;;  %1357 = vmatpush.msrb.mxu1 %v1254_v55 }
  0xe6   : > { %v1247_v7 = vsub.f32 %v1208_v2, %v1106_v62  ;;  %v1248_v8 = vsub.f32 %v1234_v3, %v1107_v63 }
  0xe7   : > { %1329 = vmatpush.msrb.mxu0 %v1249_v61  ;;  %1358 = vmatpush.msrb.mxu1 %v1250_v53 }
  0xe8   : > { %v1259_v13 = vmax.f32 %v1247_v7, 0.0  ;;  %v1260_v14 = vmax.f32 %v1248_v8, 0.0  ;;  %2062 = vmatmul.msk.f32.vlgmr.msrb.gmra.mxu0 %vm1289_vm7, %v1261_v4  ;;  %2067 = vmatmul.msk.f32.vlgmr.msrb.gmra.mxu1 %vm1289_vm7, %v1261_v4 }
  0xe9   : > { %1459 = vperm.xlu2 %2150, %v1450_v5  }
  0xea   : > { %2071 = vmatpush.msk.msrb.mxu2 %vm724_vm0, %v1259_v13  ;;  %2076 = vmatpush.msk.msrb.mxu3 %vm724_vm0, %v1260_v14 }
  0xeb   : > { %v1287_v26 = vpop.permute.xlu0 %1286 }
  0xec   : > { %1386 = vmatpush.msrb.mxu2 %v1255_v15  ;;  %1415 = vmatpush.msrb.mxu3 %v1256_v16  ;;  %v1277_v29 = vpop.permute.xlu1 %1276  ;;  %v1607_v15 = vld [vmem:[%s2837_s9] sm:$0xff]  ;;  %v1448_v16 = vld [vmem:[%s2834_s6 + $0x10] sm:$0xf] }
  0xee   : > { %1387 = vmatpush.msrb.mxu2 %v1251_v17  ;;  %1416 = vmatpush.msrb.mxu3 %v1252_v56 }
  0xef   : > { %2072 = vmatmul.msk.f32.vlgmr.msrb.gmra.mxu2 %vm1289_vm7, %v1261_v4  ;;  %2077 = vmatmul.msk.f32.vlgmr.msrb.gmra.mxu3 %vm1289_vm7, %v1261_v4 }
  0xf0   : > { %2063 = vmatmul.msk.f32.gmra.mxu0 %vm1289_vm7, %v1262_v18  ;;  %2068 = vmatmul.msk.f32.gmra.mxu1 %vm1289_vm7, %v1262_v18 }
  0xf1   : > { %1611 = vperm.xlu2 %2150, %v1607_v15  }
  0xf4   : > { %v1272_v41 = vpop.permute.xlu1 %1271 }
  0xf7   : > { %2073 = vmatmul.msk.f32.gmra.mxu2 %vm1289_vm7, %v1262_v18  ;;  %2078 = vmatmul.msk.f32.gmra.mxu3 %vm1289_vm7, %v1262_v18 }
  0xf8   : > { %2064 = vmatmul.msk.f32.gmra.mxu0 %vm1289_vm7, %v1263_v20  ;;  %2069 = vmatmul.msk.f32.gmra.mxu1 %vm1289_vm7, %v1263_v20 }
  0xfe   : > { %v1282_v34 = vpop.permute.xlu0 %1281 }
  0xff   : > { %2074 = vmatmul.msk.f32.gmra.mxu2 %vm1289_vm7, %v1263_v20  ;;  %2079 = vmatmul.msk.f32.gmra.mxu3 %vm1289_vm7, %v1263_v20 }
 0x100   : > { %2065 = vmatmul.msk.f32.gmra.mxu0 %vm1289_vm7, %v1264_v21  ;;  %2070 = vmatmul.msk.f32.gmra.mxu1 %vm1289_vm7, %v1264_v21 }
 0x107   : > { %2075 = vmatmul.msk.f32.gmra.mxu2 %vm1289_vm7, %v1264_v21  ;;  %2080 = vmatmul.msk.f32.gmra.mxu3 %vm1289_vm7, %v1264_v21 }
 0x139   : > { %v1465_v18 = vpop.permute.xlu2 %1464 }
 0x143   : > { %v1460_v21 = vpop.permute.xlu2 %1459 }
 0x14b   : > { %v1612_v5 = vpop.permute.xlu2 %1611 }
 0x165   : > { %v1331_v22 = vpop.f32.mrf.mxu0  ;;  %v1360_v23 = vpop.f32.mrf.mxu1 }
 0x166   : > { %v1332_v44 = vadd.f32 %v1331_v22, %v1272_v41  ;;  %v1361_v45 = vadd.f32 %v1360_v23, %v1272_v41 }
 0x168   : > { %v1430_v55 = vmax.f32 %v1332_v44, 0.0  ;;  %v1431_v57 = vmax.f32 %v1361_v45, 0.0 }
 0x16d   : > { %v1334_v24 = vpop.f32.mrf.mxu0  ;;  %v1363_v25 = vpop.f32.mrf.mxu1 }
 0x16e   : > { %v1335_v39 = vadd.f32 %v1334_v24, %v1277_v29  ;;  %v1364_v40 = vadd.f32 %v1363_v25, %v1277_v29 }
 0x170   : > { %v1434_v50 = vmax.f32 %v1335_v39, 0.0  ;;  %v1435_v51 = vmax.f32 %v1364_v40, 0.0  ;;  %v1605_v39 = vld [vmem:[%s2836_s8] sm:$0xff] }
 0x172   : > { %v1389_v27 = vpop.f32.mrf.mxu2  ;;  %v1418_v28 = vpop.f32.mrf.mxu3 }
 0x173   : > { %v1390_v6 = vadd.f32 %v1389_v27, %v1272_v41  ;;  %v1419_v7 = vadd.f32 %v1418_v28, %v1272_v41 }
 0x175   : > { %v1337_v30 = vpop.f32.mrf.mxu0  ;;  %v1366_v31 = vpop.f32.mrf.mxu1  ;;  %v1432_v13 = vmax.f32 %v1390_v6, 0.0  ;;  %v1433_v14 = vmax.f32 %v1419_v7, 0.0 }
 0x176   : > { %v1338_v35 = vadd.f32 %v1337_v30, %v1282_v34  ;;  %v1367_v36 = vadd.f32 %v1366_v31, %v1282_v34 }
 0x178   : > { %v1438_v48 = vmax.f32 %v1338_v35, 0.0  ;;  %v1439_v49 = vmax.f32 %v1367_v36, 0.0 }
 0x17a   : > { %v1392_v32 = vpop.f32.mrf.mxu2  ;;  %v1421_v33 = vpop.f32.mrf.mxu3 }
 0x17b   : > { %v1393_v1 = vadd.f32 %v1392_v32, %v1277_v29  ;;  %v1422_v2 = vadd.f32 %v1421_v33, %v1277_v29 }
 0x17d   : > { %v1340_v37 = vpop.f32.mrf.mxu0  ;;  %v1369_v38 = vpop.f32.mrf.mxu1  ;;  %v1436_v11 = vmax.f32 %v1393_v1, 0.0  ;;  %v1437_v12 = vmax.f32 %v1422_v2, 0.0 }
 0x17e   : > { %v1341_v42 = vadd.f32 %v1340_v37, %v1287_v26  ;;  %v1370_v43 = vadd.f32 %v1369_v38, %v1287_v26 }
 0x180   : > { %v1442_v46 = vmax.f32 %v1341_v42, 0.0  ;;  %v1443_v47 = vmax.f32 %v1370_v43, 0.0  ;;  %v1606_v42 = vld [vmem:[%s2836_s8 + $0x8] sm:$0x3] }
 0x182   : > { %v1395_v52 = vpop.f32.mrf.mxu2  ;;  %v1424_v54 = vpop.f32.mrf.mxu3  ;;  %2081 = vmatpush.msk.msra.mxu0 %vm770_vm8, %v1442_v46  ;;  %2085 = vmatpush.msk.msra.mxu1 %vm770_vm8, %v1443_v47 }
 0x183   : > { %v1396_v53 = vadd.f32 %v1395_v52, %v1282_v34  ;;  %v1425_v62 = vadd.f32 %v1424_v54, %v1282_v34 }
 0x184   : > { %1502 = vmatpush.msra.mxu0 %v1438_v48  ;;  %1528 = vmatpush.msra.mxu1 %v1439_v49 }
 0x185   : > { %v1440_v8 = vmax.f32 %v1396_v53, 0.0  ;;  %v1441_v9 = vmax.f32 %v1425_v62, 0.0  ;;  %v1733_v53 = vld [vmem:[%s2398_s20 + $0x100] sm:$0x3f]  ;;  %v1730_v62 = vld [vmem:[%s2398_s20 + $0xe8] sm:$0xf0] }
 0x186   : > { %1503 = vmatpush.msra.mxu0 %v1434_v50  ;;  %1529 = vmatpush.msra.mxu1 %v1435_v51  ;;  %v1747_v1 = vrot.slane %v1733_v53, 4  ;;  %v1749_v2 = vrot.slane %v1730_v62, 4  ;;  %v641_v53 = vld [vmem:[%s2398_s20 + $0x30] sm:$0x3] }
 0x188   : > { %1504 = vmatpush.msra.mxu0 %v1430_v55  ;;  %1530 = vmatpush.msra.mxu1 %v1431_v57 }
 0x189   : > { %2082 = vmatmul.msk.f32.vlgmr.msra.gmra.mxu0 %vm1467_vm9, %v1446_v58  ;;  %2086 = vmatmul.msk.f32.vlgmr.msra.gmra.mxu1 %vm1467_vm9, %v1446_v58 }
 0x18a   : > { %v1398_v60 = vpop.f32.mrf.mxu2  ;;  %v1427_v61 = vpop.f32.mrf.mxu3 }
 0x18b   : > { %v1399_v63 = vadd.f32 %v1398_v60, %v1287_v26  ;;  %v1428_v0 = vadd.f32 %v1427_v61, %v1287_v26  ;;  %v1455_v26 = vpop.permute.xlu0 %1454  ;;  %v1729_v61 = vld [vmem:[%s2398_s20 + $0xe0] sm:$0xf0] }
 0x18d   : > { %v1444_v3 = vmax.f32 %v1399_v63, 0.0  ;;  %v1445_v4 = vmax.f32 %v1428_v0, 0.0  ;;  %v1734_v63 = vld [vmem:[%s2398_s20 + $0x108] sm:$0x3f]  ;;  %v1746_v0 = vrot.slane %v1729_v61, 4 }
 0x18f   : > { %2089 = vmatpush.msk.msra.mxu2 %vm770_vm8, %v1444_v3  ;;  %2093 = vmatpush.msk.msra.mxu3 %vm770_vm8, %v1445_v4  ;;  %v1750_v3 = vrot.slane %v1734_v63, 4  ;;  %v1617_v4 = vpop.permute.xlu1 %1616 }
 0x191   : > { %1554 = vmatpush.msra.mxu2 %v1440_v8  ;;  %1580 = vmatpush.msra.mxu3 %v1441_v9 }
 0x192   : > { %2083 = vmatmul.msk.f32.gmra.mxu0 %vm1467_vm9, %v1447_v10  ;;  %2087 = vmatmul.msk.f32.gmra.mxu1 %vm1467_vm9, %v1447_v10 }
 0x193   : > { %1555 = vmatpush.msra.mxu2 %v1436_v11  ;;  %1581 = vmatpush.msra.mxu3 %v1437_v12  ;;  %v1748_v12 = vsel %vm724_vm0, %v1746_v0, %v1747_v1 }
 0x195   : > { %1556 = vmatpush.msra.mxu2 %v1432_v13  ;;  %1582 = vmatpush.msra.mxu3 %v1433_v14  ;;  %v1751_v13 = vsel %vm724_vm0, %v1749_v2, %v1750_v3 }
 0x196   : > { %2090 = vmatmul.msk.f32.vlgmr.msra.gmra.mxu2 %vm1467_vm9, %v1446_v58  ;;  %2094 = vmatmul.msk.f32.vlgmr.msra.gmra.mxu3 %vm1467_vm9, %v1446_v58 }
 0x19a   : > { %2084 = vmatmul.msk.f32.gmra.mxu0 %vm1467_vm9, %v1448_v16  ;;  %2088 = vmatmul.msk.f32.gmra.mxu1 %vm1467_vm9, %v1448_v16 }
 0x19e   : > { %2091 = vmatmul.msk.f32.gmra.mxu2 %vm1467_vm9, %v1447_v10  ;;  %2095 = vmatmul.msk.f32.gmra.mxu3 %vm1467_vm9, %v1447_v10 }
 0x1a6   : > { %2092 = vmatmul.msk.f32.gmra.mxu2 %vm1467_vm9, %v1448_v16  ;;  %2096 = vmatmul.msk.f32.gmra.mxu3 %vm1467_vm9, %v1448_v16 }
 0x206   : > { %v1506_v17 = vpop.f32.mrf.mxu0  ;;  %v1532_v56 = vpop.f32.mrf.mxu1 }
 0x207   : > { %v1507_v29 = vadd.f32 %v1506_v17, %v1455_v26  ;;  %v1533_v30 = vadd.f32 %v1532_v56, %v1455_v26  ;;  %v1737_v56 = vld [vmem:[%s2831_s3] sm:$0x3] }
 0x209   : > { %v1593_v37 = vmax.f32 %v1507_v29, 0.0  ;;  %v1594_v38 = vmax.f32 %v1533_v30, 0.0 }
 0x20f   : > { %v1509_v19 = vpop.f32.mrf.mxu0  ;;  %v1535_v20 = vpop.f32.mrf.mxu1 }
 0x210   : > { %v1510_v22 = vadd.f32 %v1509_v19, %v1460_v21  ;;  %v1536_v23 = vadd.f32 %v1535_v20, %v1460_v21  ;;  %v1731_v20 = vld [vmem:[%s2398_s20 + $0xf0] sm:$0xf0] }
 0x212   : > { %v1597_v35 = vmax.f32 %v1510_v22, 0.0  ;;  %v1598_v36 = vmax.f32 %v1536_v23, 0.0  ;;  %v1732_v22 = vld [vmem:[%s2398_s20 + $0xf8] sm:$0xf0] }
 0x213   : > { %v1736_v23 = vld [vmem:[%s2398_s20 + $0x118] sm:$0x3f] }
 0x217   : > { %v1512_v24 = vpop.f32.mrf.mxu0  ;;  %v1538_v25 = vpop.f32.mrf.mxu1 }
 0x218   : > { %v1513_v27 = vadd.f32 %v1512_v24, %v1465_v18  ;;  %v1539_v28 = vadd.f32 %v1538_v25, %v1465_v18  ;;  %v1752_v24 = vrot.slane %v1731_v20, 4 }
 0x219   : > { %v1558_v31 = vpop.f32.mrf.mxu2  ;;  %v1584_v32 = vpop.f32.mrf.mxu3 }
 0x21a   : > { %v1601_v33 = vmax.f32 %v1513_v27, 0.0  ;;  %v1602_v34 = vmax.f32 %v1539_v28, 0.0  ;;  %v1559_v49 = vadd.f32 %v1558_v31, %v1455_v26  ;;  %v1585_v50 = vadd.f32 %v1584_v32, %v1455_v26 }
 0x21b   : > { %v1755_v26 = vrot.slane %v1732_v22, 4  ;;  %v1756_v27 = vrot.slane %v1736_v23, 4 }
 0x21c   : > { %2097 = vmatpush.msk.msrb.mxu0 %vm724_vm0, %v1601_v33  ;;  %2100 = vmatpush.msk.msrb.mxu1 %vm724_vm0, %v1602_v34  ;;  %v1595_v57 = vmax.f32 %v1559_v49, 0.0  ;;  %v1596_v58 = vmax.f32 %v1585_v50, 0.0  ;;  %v603_v49 = vld [vmem:[%s2398_s20 + $0x8] sm:$0x1f] }
 0x21e   : > { %1651 = vmatpush.msrb.mxu0 %v1597_v35  ;;  %1674 = vmatpush.msrb.mxu1 %v1598_v36  ;;  %v1757_v35 = vsel %vm724_vm0, %v1755_v26, %v1756_v27 }
 0x220   : > { %1652 = vmatpush.msrb.mxu0 %v1593_v37  ;;  %1675 = vmatpush.msrb.mxu1 %v1594_v38 }
 0x221   : > { %v1561_v40 = vpop.f32.mrf.mxu2  ;;  %v1587_v41 = vpop.f32.mrf.mxu3  ;;  %2098 = vmatmul.msk.f32.vlgmr.msrb.gmra.mxu0 %vm1289_vm7, %v1605_v39  ;;  %2101 = vmatmul.msk.f32.vlgmr.msrb.gmra.mxu1 %vm1289_vm7, %v1605_v39 }
 0x222   : > { %v1562_v45 = vadd.f32 %v1561_v40, %v1460_v21  ;;  %v1588_v46 = vadd.f32 %v1587_v41, %v1460_v21  ;;  %v1735_v21 = vld [vmem:[%s2398_s20 + $0x110] sm:$0x3f]  ;;  %v635_v40 = vld [vmem:[%s2398_s20] sm:$0xe0]  ;;  %v639_v41 = vld [vmem:[%s2398_s20 + $0x20] sm:$0x3] }
 0x223   : > { %v1753_v25 = vrot.slane %v1735_v21, 4 }
 0x224   : > { %v1599_v54 = vmax.f32 %v1562_v45, 0.0  ;;  %v1600_v55 = vmax.f32 %v1588_v46, 0.0  ;;  %v646_v45 = vsel %vm645_vm10, %v639_v41, -inf  ;;  %v602_v46 = vld [vmem:[%s2398_s20] sm:$0x1f] }
 0x225   : > { %v1754_v34 = vsel %vm724_vm0, %v1752_v24, %v1753_v25  ;;  %v607_v50 = vsel %vm606_vm13, %v602_v46, -inf }
 0x229   : > { %v1564_v43 = vpop.f32.mrf.mxu2  ;;  %v1590_v44 = vpop.f32.mrf.mxu3  ;;  %2099 = vmatmul.msk.f32.gmra.mxu0 %vm1289_vm7, %v1606_v42  ;;  %2102 = vmatmul.msk.f32.gmra.mxu1 %vm1289_vm7, %v1606_v42 }
 0x22a   : > { %v1565_v47 = vadd.f32 %v1564_v43, %v1465_v18  ;;  %v1591_v48 = vadd.f32 %v1590_v44, %v1465_v18  ;;  %v640_v43 = vld [vmem:[%s2398_s20 + $0x28] sm:$0x3]  ;;  %v644_v44 = vsel %vm643_vm12, %v635_v40, -inf }
 0x22c   : > { %v1603_v51 = vmax.f32 %v1565_v47, 0.0  ;;  %v1604_v52 = vmax.f32 %v1591_v48, 0.0  ;;  %v647_v47 = vmax.f32 %v644_v44, %v646_v45 }
 0x22e   : > { %2103 = vmatpush.msk.msrb.mxu2 %vm724_vm0, %v1603_v51  ;;  %2106 = vmatpush.msk.msrb.mxu3 %vm724_vm0, %v1604_v52  ;;  %v655_v51 = vsel %vm645_vm10, %v640_v43, -inf  ;;  %v604_v52 = vld [vmem:[%s2398_s20 + $0x10] sm:$0x1f]  ;;  %v684_v43 = vld [vmem:[%s2398_s20 + $0x38] sm:$0x7c] }
 0x22f   : > { %v621_v61 = vsel %vm606_vm13, %v604_v52, -inf  ;;  %v714_v52 = vld [vmem:[%s2398_s20 + $0x20] sm:$0x80] }
 0x230   : > { %1697 = vmatpush.msrb.mxu2 %v1599_v54  ;;  %1720 = vmatpush.msrb.mxu3 %v1600_v55  ;;  %v608_v54 = vrot.slane %v607_v50, 4  ;;  %v614_v55 = vsel %vm606_vm13, %v603_v49, -inf  ;;  %v622_v63 = vrot.slane %v621_v61, 4 }
 0x232   : > { %1698 = vmatpush.msrb.mxu2 %v1595_v57  ;;  %1721 = vmatpush.msrb.mxu3 %v1596_v58  ;;  %v637_v57 = vld [vmem:[%s2398_s20 + $0x10] sm:$0xe0]  ;;  %v609_v62 = vmax.f32 %v607_v50, %v608_v54 }
 0x233   : > { %2104 = vmatmul.msk.f32.vlgmr.msrb.gmra.mxu2 %vm1289_vm7, %v1605_v39  ;;  %2107 = vmatmul.msk.f32.vlgmr.msrb.gmra.mxu3 %vm1289_vm7, %v1605_v39 }
 0x23b   : > { %2105 = vmatmul.msk.f32.gmra.mxu2 %vm1289_vm7, %v1606_v42  ;;  %2108 = vmatmul.msk.f32.gmra.mxu3 %vm1289_vm7, %v1606_v42  ;;  %v636_v42 = vld [vmem:[%s2398_s20 + $0x8] sm:$0xe0] }
 0x23c   : > { %v654_v48 = vsel %vm643_vm12, %v636_v42, -inf }
 0x23d   : > { %v656_v58 = vmax.f32 %v654_v48, %v655_v51 }
 0x29e   : > { %v1654_v59 = vpop.f32.mrf.mxu0  ;;  %v1677_v60 = vpop.f32.mrf.mxu1 }
 0x29f   : > { %v1655_v8 = vadd.f32 %v1654_v59, %v1612_v5  ;;  %v1678_v9 = vadd.f32 %v1677_v60, %v1612_v5  ;;  %v605_v59 = vld [vmem:[%s2398_s20 + $0x18] sm:$0x1f]  ;;  %v615_v60 = vrot.slane %v614_v55, 4 }
 0x2a0   : > { %v628_v0 = vsel %vm606_vm13, %v605_v59, -inf  ;;  %v718_v59 = vld [vmem:[%s2398_s20 + $0x40] sm:$0xf] }
 0x2a1   : > { %v1766_v16 = vadd.f32 %v1748_v12, %v1655_v8  ;;  %v1767_v17 = vadd.f32 %v1751_v13, %v1678_v9  ;;  %v616_v2 = vmax.f32 %v614_v55, %v615_v60  ;;  %v623_v8 = vmax.f32 %v621_v61, %v622_v63  ;;  %v642_v13 = vld [vmem:[%s2398_s20 + $0x38] sm:$0x3] }
 0x2a2   : > { %v673_v26 = vsel %vm645_vm10, %v642_v13, -inf }
 0x2a6   : > { %v1657_v6 = vpop.f32.mrf.mxu0  ;;  %v1680_v7 = vpop.f32.mrf.mxu1 }
 0x2a7   : > { %v1658_v10 = vadd.f32 %v1657_v6, %v1617_v4  ;;  %v1681_v11 = vadd.f32 %v1680_v7, %v1617_v4  ;;  %v663_v6 = vsel %vm643_vm12, %v637_v57, -inf  ;;  %v610_v7 = vrot.slane %v609_v62, 2 }
 0x2a9   : > { %v1770_v14 = vadd.f32 %v1747_v1, %v1658_v10  ;;  %v1771_v15 = vadd.f32 %v1750_v3, %v1681_v11  ;;  %v648_v1 = vrot.slane %v647_v47, 4  ;;  %v629_v3 = vrot.slane %v628_v0, 4 }
 0x2aa   : > { %v664_v10 = vsel %vm645_vm10, %v641_v53, -inf  ;;  %v617_v11 = vrot.slane %v616_v2, 2 }
 0x2ab   : > { %2109 = vmatpush.msk.msra.mxu0 %vm645_vm10, %v1770_v14  ;;  %2111 = vmatpush.msk.msra.mxu1 %vm645_vm10, %v1771_v15  ;;  %v649_v9 = vmax.f32 %v647_v47, %v648_v1  ;;  %v630_v12 = vmax.f32 %v628_v0, %v629_v3  ;;  %v665_v15 = vmax.f32 %v663_v6, %v664_v10  ;;  %v715_v1 = vld [vmem:[%s2398_s20 + $0x28] sm:$0x80]  ;;  %v719_v6 = vld [vmem:[%s2398_s20 + $0x48] sm:$0xf] }
 0x2ad   : > { %1805 = vmatpush.msra.mxu0 %v1766_v16  ;;  %1825 = vmatpush.msra.mxu1 %v1767_v17  ;;  %v611_v16 = vmax.f32 %v609_v62, %v610_v7  ;;  %v624_v17 = vrot.slane %v623_v8, 2  ;;  %v631_v20 = vrot.slane %v630_v12, 2  ;;  %v666_v22 = vrot.slane %v665_v15, 4 }
 0x2ae   : > { %2112 = vmatmul.msk.f32.vlgmr.msra.gmra.mxu1 %vm1774_vm11, %v1737_v56  ;;  %2110 = vmatmul.msk.f32.vlgmr.msra.gmra.mxu0 %vm1774_vm11, %v1737_v56  ;;  %v725_v7 = vsel %vm724_vm0, %v718_v59, -inf  ;;  %v766_v59 = vld [vmem:[%s2398_s20 + $0x70] sm:$0x1] }
 0x2af   : > { %v612_v23 = vrot.slane %v611_v16, 1  ;;  %v625_v24 = vmax.f32 %v623_v8, %v624_v17 }
 0x2b6   : > { %v1700_v18 = vpop.f32.mrf.mxu2  ;;  %v1723_v19 = vpop.f32.mrf.mxu3 }
 0x2b7   : > { %v1701_v30 = vadd.f32 %v1700_v18, %v1612_v5  ;;  %v1724_v31 = vadd.f32 %v1723_v19, %v1612_v5  ;;  %v657_v5 = vrot.slane %v656_v58, 4  ;;  %v618_v19 = vmax.f32 %v616_v2, %v617_v11 }
 0x2b8   : > { %v723_v2 = vsel %vm722_vm15, %v714_v52, -inf }
 0x2b9   : > { %v1768_v38 = vadd.f32 %v1754_v34, %v1701_v30  ;;  %v1769_v39 = vadd.f32 %v1757_v35, %v1724_v31  ;;  %v658_v14 = vmax.f32 %v656_v58, %v657_v5  ;;  %v667_v30 = vmax.f32 %v665_v15, %v666_v22  ;;  %v681_v34 = vld [vmem:[%s2398_s20 + $0x20] sm:$0x7c] }
 0x2ba   : > { %v626_v31 = vrot.slane %v625_v24, 1  ;;  %v2616_v35 = vmax.f32 %v611_v16, %v612_v23  ;;  %v686_v47 = vsel %vm685_vm14, %v681_v34, -inf  ;;  %v707_v58 = vsel %vm685_vm14, %v684_v43, -inf  ;;  %v764_v43 = vld [vmem:[%s2398_s20 + $0x60] sm:$0x1] }
 0x2bb   : > { %v659_v21 = vrot.slane %v658_v14, 2  ;;  %v687_v49 = vrot.slane %v686_v47, 4  ;;  %v708_v53 = vrot.slane %v707_v58, 4  ;;  %v726_v11 = vmax.f32 %v723_v2, %v725_v7 }
 0x2bc   : > { %v2623_v44 = vmax.f32 %v625_v24, %v626_v31  ;;  %v733_v15 = vsel %vm722_vm15, %v715_v1, -inf  ;;  %v763_v1 = vld [vmem:[%s2398_s20 + $0x58] sm:$0xf0] }
 0x2bd   : > { %v688_v61 = vmax.f32 %v686_v47, %v687_v49  ;;  %v709_v5 = vmax.f32 %v707_v58, %v708_v53  ;;  %v765_v58 = vld [vmem:[%s2398_s20 + $0x68] sm:$0x1] }
 0x2be   : > { %v1703_v28 = vpop.f32.mrf.mxu2  ;;  %v1726_v29 = vpop.f32.mrf.mxu3 }
 0x2bf   : > { %v1704_v32 = vadd.f32 %v1703_v28, %v1617_v4  ;;  %v1727_v33 = vadd.f32 %v1726_v29, %v1617_v4  ;;  %v638_v4 = vld [vmem:[%s2398_s20 + $0x18] sm:$0xe0]  ;;  %v632_v28 = vmax.f32 %v630_v12, %v631_v20  ;;  %v660_v29 = vmax.f32 %v658_v14, %v659_v21 }
 0x2c0   : > { %v672_v18 = vsel %vm643_vm12, %v638_v4, -inf  ;;  %v689_v4 = vrot.slane %v688_v61, 2  ;;  %v710_v14 = vrot.slane %v709_v5, 2  ;;  %v727_v20 = vrot.slane %v726_v11, 4 }
 0x2c1   : > { %v1772_v36 = vadd.f32 %v1753_v25, %v1704_v32  ;;  %v1773_v37 = vadd.f32 %v1756_v27, %v1727_v33  ;;  %v619_v27 = vrot.slane %v618_v19, 1  ;;  %v674_v33 = vmax.f32 %v672_v18, %v673_v26  ;;  %v716_v18 = vld [vmem:[%s2398_s20 + $0x30] sm:$0x80] }
 0x2c2   : > { %v661_v41 = vrot.slane %v660_v29, 1  ;;  %v690_v13 = vmax.f32 %v688_v61, %v689_v4  ;;  %v734_v21 = vsel %vm724_vm0, %v719_v6, -inf  ;;  %v742_v34 = vsel %vm722_vm15, %v716_v18, -inf }
 0x2c3   : > { %2113 = vmatpush.msk.msra.mxu2 %vm645_vm10, %v1772_v36  ;;  %2115 = vmatpush.msk.msra.mxu3 %vm645_vm10, %v1773_v37  ;;  %v633_v36 = vrot.slane %v632_v28, 1  ;;  %v668_v37 = vrot.slane %v667_v30, 2  ;;  %v2620_v40 = vmax.f32 %v618_v19, %v619_v27  ;;  %v675_v42 = vrot.slane %v674_v33, 4  ;;  %v720_v19 = vld [vmem:[%s2398_s20 + $0x50] sm:$0xf] }
 0x2c4   : > { %v2635_v8 = vmax.f32 %v660_v29, %v661_v41  ;;  %v691_v24 = vrot.slane %v690_v13, 1  ;;  %v721_v29 = vld [vmem:[%s2398_s20 + $0x58] sm:$0xf]  ;;  %v735_v31 = vmax.f32 %v733_v15, %v734_v21  ;;  %v780_v6 = vsel %vm770_vm8, %v765_v58, -inf }
 0x2c5   : > { %1845 = vmatpush.msra.mxu2 %v1768_v38  ;;  %1865 = vmatpush.msra.mxu3 %v1769_v39  ;;  %v682_v38 = vld [vmem:[%s2398_s20 + $0x28] sm:$0x7c]  ;;  %v683_v39 = vld [vmem:[%s2398_s20 + $0x30] sm:$0x7c]  ;;  %v669_v46 = vmax.f32 %v667_v30, %v668_v37  ;;  %v676_v48 = vmax.f32 %v674_v33, %v675_v42  ;;  %v2628_v54 = vmax.f32 %v632_v28, %v633_v36  ;;  %v717_v28 = vld [vmem:[%s2398_s20 + $0x38] sm:$0x80] }
 0x2c6   : > { %2114 = vmatmul.msk.f32.vlgmr.msra.gmra.mxu2 %vm1774_vm11, %v1737_v56  ;;  %2116 = vmatmul.msk.f32.vlgmr.msra.gmra.mxu3 %vm1774_vm11, %v1737_v56  ;;  %v650_v56 = vrot.slane %v649_v9, 2  ;;  %v693_v50 = vsel %vm685_vm14, %v682_v38, -inf  ;;  %v700_v51 = vsel %vm685_vm14, %v683_v39, -inf  ;;  %v728_v30 = vmax.f32 %v726_v11, %v727_v20  ;;  %v760_v42 = vld [vmem:[%s2398_s20 + $0x40] sm:$0xf0] }
 0x2c7   : > { %v694_v55 = vrot.slane %v693_v50, 4  ;;  %v701_v57 = vrot.slane %v700_v51, 4  ;;  %v677_v60 = vrot.slane %v676_v48, 2  ;;  %v670_v62 = vrot.slane %v669_v46, 1 }
 0x2c8   : > { %v651_v25 = vmax.f32 %v649_v9, %v650_v56  ;;  %v743_v36 = vsel %vm724_vm0, %v720_v19, -inf  ;;  %v2652_v37 = vmax.f32 %v690_v13, %v691_v24  ;;  %v729_v39 = vrot.slane %v728_v30, 2 }
 0x2c9   : > { %v695_v63 = vmax.f32 %v693_v50, %v694_v55  ;;  %v702_v0 = vmax.f32 %v700_v51, %v701_v57  ;;  %v678_v3 = vmax.f32 %v676_v48, %v677_v60  ;;  %v2644_v23 = vmax.f32 %v669_v46, %v670_v62  ;;  %v761_v50 = vld [vmem:[%s2398_s20 + $0x48] sm:$0xf0]  ;;  %v762_v51 = vld [vmem:[%s2398_s20 + $0x50] sm:$0xf0] }
 0x2ca   : > { %v652_v32 = vrot.slane %v651_v25, 1  ;;  %v736_v41 = vrot.slane %v735_v31, 4  ;;  %v744_v47 = vmax.f32 %v742_v34, %v743_v36  ;;  %v751_v48 = vsel %vm722_vm15, %v717_v28, -inf  ;;  %v806_v28 = vld [vmem:[%s2398_s20 + $0x60] sm:$0x3e] }
 0x2cb   : > { %v696_v9 = vrot.slane %v695_v63, 2  ;;  %v703_v10 = vrot.slane %v702_v0, 2  ;;  %v679_v12 = vrot.slane %v678_v3, 1  ;;  %v752_v49 = vsel %vm724_vm0, %v721_v29, -inf  ;;  %v807_v29 = vld [vmem:[%s2398_s20 + $0x68] sm:$0x3e] }
 0x2cc   : > { %v2625_v45 = vmax.f32 %v651_v25, %v652_v32  ;;  %v711_v25 = vmax.f32 %v709_v5, %v710_v14  ;;  %v730_v52 = vmax.f32 %v728_v30, %v729_v39  ;;  %v737_v55 = vmax.f32 %v735_v31, %v736_v41  ;;  %v767_v5 = vld [vmem:[%s2398_s20 + $0x78] sm:$0x1] }
 0x2cd   : > { %v697_v17 = vmax.f32 %v695_v63, %v696_v9  ;;  %v704_v56 = vmax.f32 %v702_v0, %v703_v10  ;;  %v2648_v32 = vmax.f32 %v678_v3, %v679_v12  ;;  %v753_v57 = vmax.f32 %v751_v48, %v752_v49 }
 0x2ce   : > { %v712_v33 = vrot.slane %v711_v25, 1  ;;  %v745_v61 = vrot.slane %v744_v47, 4  ;;  %v769_v53 = vsel %vm768_vm3, %v760_v42, -inf  ;;  %v771_v62 = vsel %vm770_vm8, %v764_v43, -inf }
 0x2cf   : > { %v698_v26 = vrot.slane %v697_v17, 1  ;;  %v705_v27 = vrot.slane %v704_v56, 1  ;;  %v738_v63 = vrot.slane %v737_v55, 2  ;;  %v754_v0 = vrot.slane %v753_v57, 4 }
 0x2d0   : > { %v2666_v60 = vmax.f32 %v711_v25, %v712_v33  ;;  %v772_v2 = vmax.f32 %v769_v53, %v771_v62  ;;  %v779_v3 = vsel %vm768_vm3, %v761_v50, -inf  ;;  %v746_v4 = vmax.f32 %v744_v47, %v745_v61  ;;  %v808_v47 = vld [vmem:[%s2398_s20 + $0x70] sm:$0x3e] }
 0x2d1   : > { %v2654_v38 = vmax.f32 %v697_v17, %v698_v26  ;;  %v2658_v46 = vmax.f32 %v704_v56, %v705_v27  ;;  %v788_v7 = vsel %vm768_vm3, %v762_v51, -inf  ;;  %v789_v9 = vsel %vm770_vm8, %v766_v59, -inf  ;;  %v809_v59 = vld [vmem:[%s2398_s20 + $0x78] sm:$0x3e] }
 0x2d2   : > { %v731_v10 = vrot.slane %v730_v52, 1  ;;  %v739_v11 = vmax.f32 %v737_v55, %v738_v63  ;;  %v755_v12 = vmax.f32 %v753_v57, %v754_v0  ;;  %v773_v13 = vrot.slane %v772_v2, 4 }
 0x2d3   : > { %v747_v14 = vrot.slane %v746_v4, 2  ;;  %v781_v15 = vmax.f32 %v779_v3, %v780_v6  ;;  %v790_v17 = vmax.f32 %v788_v7, %v789_v9  ;;  %v797_v56 = vsel %vm768_vm3, %v763_v1, -inf  ;;  %v839_v6 = vld [vmem:[%s2398_s20 + $0x60] sm:$0xc0]  ;;  %v840_v7 = vld [vmem:[%s2398_s20 + $0x68] sm:$0xc0] }
 0x2d4   : > { %v740_v18 = vrot.slane %v739_v11, 1  ;;  %v756_v19 = vrot.slane %v755_v12, 2  ;;  %v774_v20 = vmax.f32 %v772_v2, %v773_v13  ;;  %v798_v21 = vsel %vm770_vm8, %v767_v5, -inf  ;;  %v843_v13 = vld [vmem:[%s2398_s20 + $0x80] sm:$0x7] }
 0x2d5   : > { %v748_v24 = vmax.f32 %v746_v4, %v747_v14  ;;  %v782_v25 = vrot.slane %v781_v15, 4  ;;  %v791_v26 = vrot.slane %v790_v17, 4  ;;  %v799_v27 = vmax.f32 %v797_v56, %v798_v21 }
 0x2d6   : > { %v2680_v30 = vmax.f32 %v730_v52, %v731_v10  ;;  %v757_v31 = vmax.f32 %v755_v12, %v756_v19  ;;  %v775_v33 = vrot.slane %v774_v20, 2  ;;  %v811_v48 = vsel %vm810_vm4, %v806_v28, -inf }
 0x2d7   : > { %v749_v34 = vrot.slane %v748_v24, 1  ;;  %v783_v36 = vmax.f32 %v781_v15, %v782_v25  ;;  %v792_v39 = vmax.f32 %v790_v17, %v791_v26  ;;  %v800_v41 = vrot.slane %v799_v27, 4 }
 0x2d8   : > { %v758_v42 = vrot.slane %v757_v31, 1  ;;  %v776_v43 = vmax.f32 %v774_v20, %v775_v33  ;;  %v818_v49 = vsel %vm810_vm4, %v807_v29, -inf  ;;  %v2685_v50 = vmax.f32 %v739_v11, %v740_v18  ;;  %v844_v18 = vld [vmem:[%s2398_s20 + $0x88] sm:$0x7]  ;;  %v841_v29 = vld [vmem:[%s2398_s20 + $0x70] sm:$0xc0] }
 0x2d9   : > { %v784_v51 = vrot.slane %v783_v36, 2  ;;  %v793_v52 = vrot.slane %v792_v39, 2  ;;  %v801_v55 = vmax.f32 %v799_v27, %v800_v41  ;;  %v2687_v57 = vmax.f32 %v748_v24, %v749_v34 }
 0x2da   : > { %v777_v58 = vrot.slane %v776_v43, 1  ;;  %v812_v61 = vrot.slane %v811_v48, 4  ;;  %v819_v53 = vrot.slane %v818_v49, 4  ;;  %v825_v1 = vsel %vm810_vm4, %v808_v47, -inf }
 0x2db   : > { %v785_v62 = vmax.f32 %v783_v36, %v784_v51  ;;  %v794_v63 = vmax.f32 %v792_v39, %v793_v52  ;;  %v802_v0 = vrot.slane %v801_v55, 2  ;;  %v2691_v2 = vmax.f32 %v757_v31, %v758_v42  ;;  %v845_v31 = vld [vmem:[%s2398_s20 + $0x90] sm:$0x7] }
 0x2dc   : > { %v813_v3 = vmax.f32 %v811_v48, %v812_v61  ;;  %v820_v4 = vmax.f32 %v818_v49, %v819_v53  ;;  %v826_v5 = vrot.slane %v825_v1, 4  ;;  %v832_v12 = vsel %vm810_vm4, %v809_v59, -inf  ;;  %v842_v48 = vld [vmem:[%s2398_s20 + $0x78] sm:$0xc0]  ;;  %v846_v49 = vld [vmem:[%s2398_s20 + $0x98] sm:$0x7] }
 0x2dd   : > { %v786_v9 = vrot.slane %v785_v62, 1  ;;  %v795_v10 = vrot.slane %v794_v63, 1  ;;  %v803_v11 = vmax.f32 %v801_v55, %v802_v0  ;;  %v833_v56 = vrot.slane %v832_v12, 4 }
 0x2de   : > { %v814_v14 = vrot.slane %v813_v3, 2  ;;  %v821_v15 = vrot.slane %v820_v4, 2  ;;  %v827_v17 = vmax.f32 %v825_v1, %v826_v5  ;;  %v2698_v19 = vmax.f32 %v776_v43, %v777_v58 }
 0x2df   : > { %v2700_v20 = vmax.f32 %v785_v62, %v786_v9  ;;  %v804_v21 = vrot.slane %v803_v11, 1  ;;  %v848_v24 = vsel %vm847_vm1, %v839_v6, -inf  ;;  %v834_v28 = vmax.f32 %v832_v12, %v833_v56 }
 0x2e0   : > { %v815_v25 = vmax.f32 %v813_v3, %v814_v14  ;;  %v822_v26 = vmax.f32 %v820_v4, %v821_v15  ;;  %v828_v27 = vrot.slane %v827_v17, 2  ;;  %v2705_v33 = vmax.f32 %v794_v63, %v795_v10  ;;  %v885_v4 = vld [vmem:[%s2398_s20 + $0x80] sm:$0xf8]  ;;  %v886_v15 = vld [vmem:[%s2398_s20 + $0x88] sm:$0xf8] }
 0x2e1   : > { %v850_v34 = vsel %vm849_vm2, %v843_v13, -inf  ;;  %v858_v36 = vsel %vm847_vm1, %v840_v7, -inf  ;;  %v859_v39 = vsel %vm849_vm2, %v844_v18, -inf  ;;  %v835_v47 = vrot.slane %v834_v28, 2 }
 0x2e2   : > { %v816_v41 = vrot.slane %v815_v25, 1  ;;  %v823_v42 = vrot.slane %v822_v26, 1  ;;  %v829_v43 = vmax.f32 %v827_v17, %v828_v27  ;;  %v851_v51 = vmax.f32 %v848_v24, %v850_v34  ;;  %v887_v17 = vld [vmem:[%s2398_s20 + $0x90] sm:$0xf8] }
 0x2e3   : > { %v860_v52 = vmax.f32 %v858_v36, %v859_v39  ;;  %v867_v55 = vsel %vm847_vm1, %v841_v29, -inf  ;;  %v868_v58 = vsel %vm849_vm2, %v845_v31, -inf  ;;  %v2714_v59 = vmax.f32 %v803_v11, %v804_v21 }
 0x2e4   : > { %v2716_v61 = vmax.f32 %v815_v25, %v816_v41  ;;  %v830_v53 = vrot.slane %v829_v43, 1  ;;  %v836_v62 = vmax.f32 %v834_v28, %v835_v47  ;;  %v852_v63 = vrot.slane %v851_v51, 4  ;;  %v888_v28 = vld [vmem:[%s2398_s20 + $0x98] sm:$0xf8]  ;;  %s2742_s20 = sshll.u32 %s2025_s24, 2 }
 0x2e5   : > { %v861_v0 = vrot.slane %v860_v52, 4  ;;  %v869_v1 = vmax.f32 %v867_v55, %v868_v58  ;;  %v876_v3 = vsel %vm847_vm1, %v842_v48, -inf  ;;  %v2724_v7 = vmax.f32 %v822_v26, %v823_v42  ;;  %p578_p8 = scmp.lt.s32.totalorder %s2742_s20, 7 }
 0x2e6   : > { %v837_v9 = vrot.slane %v836_v62, 1  ;;  %v877_v10 = vsel %vm849_vm2, %v846_v49, -inf  ;;  %v2728_v12 = vmax.f32 %v829_v43, %v830_v53  ;;  %v853_v13 = vmax.f32 %v851_v51, %v852_v63 }
 0x2e7   : > { %v862_v14 = vmax.f32 %v860_v52, %v861_v0  ;;  %v870_v18 = vrot.slane %v869_v1, 4  ;;  %v878_v21 = vmax.f32 %v876_v3, %v877_v10  ;;  %v890_v24 = vsel %vm889_vm5, %v885_v4, -inf  ;;  %s2846_s20 = smov (!%p578_p8, %s2742_s20), 7 }
 0x2e8   : > { %v2734_v25 = vmax.f32 %v836_v62, %v837_v9  ;;  %v854_v26 = vrot.slane %v853_v13, 2  ;;  %v891_v29 = vrot.slane %v890_v24, 4  ;;  %v897_v36 = vsel %vm889_vm5, %v886_v15, -inf  ;;  %s2037_s23 = sshll.u32 %s2846_s20, 3  ;;  %s592_s27 = scalar_lea.vmem %s2840_s12, %s2846_s20 }
 0x2e9   : > { %v863_v27 = vrot.slane %v862_v14, 2  ;;  %v871_v31 = vmax.f32 %v869_v1, %v870_v18  ;;  %v879_v34 = vrot.slane %v878_v21, 4  ;;  %v904_v39 = vsel %vm889_vm5, %v887_v17, -inf  ;;  %s581_s18 = scalar_lea.vmem %s2838_s10, %s2037_s23 }
 0x2ea   : > { %v855_v41 = vmax.f32 %v853_v13, %v854_v26  ;;  %v892_v43 = vmax.f32 %v890_v24, %v891_v29  ;;  %v898_v47 = vrot.slane %v897_v36, 4  ;;  %v905_v51 = vrot.slane %v904_v39, 4 }
 0x2eb   : > { %v864_v42 = vmax.f32 %v862_v14, %v863_v27  ;;  %v872_v48 = vrot.slane %v871_v31, 2  ;;  %v880_v49 = vmax.f32 %v878_v21, %v879_v34  ;;  %v911_v52 = vsel %vm889_vm5, %v888_v28, -inf }
 0x2ec   : > { %v856_v55 = vrot.slane %v855_v41, 1  ;;  %v893_v53 = vrot.slane %v892_v43, 2  ;;  %v899_v62 = vmax.f32 %v897_v36, %v898_v47  ;;  %v906_v1 = vmax.f32 %v904_v39, %v905_v51 }
 0x2ed   : > { %v865_v58 = vrot.slane %v864_v42, 1  ;;  %v873_v63 = vmax.f32 %v871_v31, %v872_v48  ;;  %v881_v0 = vrot.slane %v880_v49, 2  ;;  %v912_v3 = vrot.slane %v911_v52, 4 }
 0x2ee   : > { %v857_v4 = vmax.f32 %v855_v41, %v856_v55  ;;  %v894_v10 = vmax.f32 %v892_v43, %v893_v53  ;;  %v900_v13 = vrot.slane %v899_v62, 2  ;;  %v907_v17 = vrot.slane %v906_v1, 2  ;;  %v596_v55 = vld [vmem:[%s2394_s19 + $0x10] sm:$0xff] }
 0x2ef   : > { %v866_v9 = vmax.f32 %v864_v42, %v865_v58  ;;  %v874_v14 = vrot.slane %v873_v63, 1  ;;  %v882_v15 = vmax.f32 %v880_v49, %v881_v0  ;;  %v913_v18 = vmax.f32 %v911_v52, %v912_v3  ;;  %v594_v52 = vld [vmem:[%s2394_s19] sm:$0xff] }
 0x2f0   : > { %v895_v21 = vrot.slane %v894_v10, 1  ;;  %v901_v24 = vmax.f32 %v899_v62, %v900_v13  ;;  %v918_v26 = vsel %vm770_vm8, %v2616_v35, %v2625_v45  ;;  %v919_v27 = vsel %vm770_vm8, %v2620_v40, %v2635_v8 }
 0x2f1   : > { %v875_v28 = vmax.f32 %v873_v63, %v874_v14  ;;  %v883_v29 = vrot.slane %v882_v15, 1  ;;  %v908_v31 = vmax.f32 %v906_v1, %v907_v17  ;;  %v914_v34 = vrot.slane %v913_v18, 2 }
 0x2f2   : > { %v896_v36 = vmax.f32 %v894_v10, %v895_v21  ;;  %v902_v39 = vrot.slane %v901_v24, 1  ;;  %v920_v41 = vsel %vm770_vm8, %v2623_v44, %v2644_v23  ;;  %v921_v42 = vsel %vm770_vm8, %v2628_v54, %v2648_v32 }
 0x2f3   : > { %v884_v43 = vmax.f32 %v882_v15, %v883_v29  ;;  %v909_v35 = vrot.slane %v908_v31, 1  ;;  %v915_v45 = vmax.f32 %v913_v18, %v914_v34  ;;  %v922_v40 = vsel %vm645_vm10, %v918_v26, %v2652_v37  ;;  %v1089_v15 = vld [vmem:[#allocation1 + $0x4] ss:$9 sm:$0xff] }
 0x2f4   : > { %v903_v8 = vmax.f32 %v901_v24, %v902_v39  ;;  %v923_v47 = vsel %vm645_vm10, %v919_v27, %v2654_v38  ;;  %v924_v44 = vsel %vm645_vm10, %v920_v41, %v2658_v46  ;;  %v925_v54 = vsel %vm645_vm10, %v921_v42, %v2666_v60 }
 0x2f5   : > { %v910_v23 = vmax.f32 %v908_v31, %v909_v35  ;;  %v916_v32 = vrot.slane %v915_v45, 1  ;;  %v926_v37 = vsel %vm849_vm2, %v922_v40, %v2680_v30  ;;  %v927_v48 = vsel %vm849_vm2, %v923_v47, %v2685_v50 }
 0x2f6   : > { %v928_v38 = vsel %vm849_vm2, %v924_v44, %v2687_v57  ;;  %v929_v46 = vsel %vm849_vm2, %v925_v54, %v2691_v2  ;;  %v930_v60 = vsel %vm724_vm0, %v926_v37, %v2698_v19  ;;  %v931_v49 = vsel %vm724_vm0, %v927_v48, %v2700_v20 }
 0x2f7   : > { %v917_v51 = vmax.f32 %v915_v45, %v916_v32  ;;  %v932_v30 = vsel %vm724_vm0, %v928_v38, %v2705_v33  ;;  %v933_v50 = vsel %vm724_vm0, %v929_v46, %v2714_v59  ;;  %v934_v57 = vsel %vm606_vm13, %v930_v60, %v2716_v61  ;;  %v595_v33 = vld [vmem:[%s2394_s19 + $0x8] sm:$0xff]  ;;  %v597_v61 = vld [vmem:[%s2394_s19 + $0x18] sm:$0xff]  ;;  %s2039_s19 = sshll.u32 %s2846_s20, 1 }
 0x2f8   : > { %v935_v2 = vsel %vm606_vm13, %v931_v49, %v2724_v7  ;;  %v936_v19 = vsel %vm606_vm13, %v932_v30, %v2728_v12  ;;  %v937_v20 = vsel %vm606_vm13, %v933_v50, %v2734_v25  ;;  %vm938_vm1 = vcmask 1045504   ;;  %s587_s29 = scalar_lea.vmem %s2839_s11, %s2039_s19 }
 0x2f9   : > { %v939_v58 = vsel %vm938_vm1, %v934_v57, %v857_v4  ;;  %v940_v53 = vsel %vm938_vm1, %v935_v2, %v866_v9  ;;  %v941_v59 = vsel %vm938_vm1, %v936_v19, %v875_v28  ;;  %v942_v62 = vsel %vm938_vm1, %v937_v20, %v884_v43 }
 0x2fa   : > { %vm1878_vm2 = vcmask 1045508   ;;  %v1091_v7 = vlaneseq  ;;  %v944_v12 = vsel %vm943_vm6, %v939_v58, %v896_v36  ;;  %v945_v25 = vsel %vm943_vm6, %v940_v53, %v903_v8 }
 0x2fb   : > { %v946_v0 = vsel %vm943_vm6, %v941_v59, %v910_v23  ;;  %v947_v1 = vsel %vm943_vm6, %v942_v62, %v917_v51  ;;  %v948_v3 = vadd.f32 %v944_v12, %v594_v52  ;;  %v949_v4 = vadd.f32 %v945_v25, %v595_v33 }
 0x2fc   : > { %v950_v9 = vadd.f32 %v946_v0, %v596_v55  ;;  %v951_v13 = vadd.f32 %v947_v1, %v597_v61  ;;  %vm1093_vm7 = vcmp.lt.s32.totalorder %v1091_v7, 512 }
 0x2fd   : > { %952 = vst [vmem:[%s581_s18] sm:$0xff] %v948_v3 }
 0x2fe   : > { %953 = vst [vmem:[%s581_s18 + $0x8] sm:$0xff] %v949_v4 }
 0x2ff   : > { %954 = vst [vmem:[%s581_s18 + $0x10] sm:$0xff] %v950_v9 }
 0x300   : > { %955 = vst [vmem:[%s581_s18 + $0x18] sm:$0xff] %v951_v13 }
 0x301   : > { %1095 = vst.msk [vmem:[%s592_s27] sm:$0xf] %vm1093_vm7, %v1089_v15 }
 0x32b   : > { %v2638_v16 = vpop.f32.mrf.mxu1  ;;  %v1807_v63 = vpop.f32.mrf.mxu0 }
 0x32c   : > { %v1874_v22 = vrot.slane %v2638_v16, 6 }
 0x32e   : > { %v1877_v14 = vsel %vm645_vm10, %v1807_v63, %v1874_v22 }
 0x349   : > { %v2720_v5 = vpop.f32.mrf.mxu2  ;;  %v2722_v6 = vpop.f32.mrf.mxu3 }
 0x34a   : > { %v1875_v11 = vrot.slane %v2720_v5, 4  ;;  %v1876_v56 = vrot.slane %v2722_v6, 2 }
 0x34c   : > { %v1879_v10 = vsel %vm1878_vm2, %v1875_v11, %v1876_v56 }
 0x34d   : > { %v1880_v5 = vsel %vm724_vm0, %v1877_v14, %v1879_v10 }
 0x34e   : > { %1882 = vst [vmem:[%s587_s29] sm:$0xff] %v1880_v5 }
 0x34f PF: > { %p20_p9 = scmp.ge.s32.totalorder %s2274_s25, 4   ;;  %s2842_s21 = smov %s2185_s22 }
 0x350   : > { %s2843_s22 = smov %s2283_s28  ;;  %s2844_s23 = smov %s2274_s25 }
 0x351   :  { %22 = sbr.rel (!%p20_p9) target bundleno = 2 (0x2), region = 174 }

</bundles_post_ra>
